<compile_context>
chip_gen: v6e
topology: v6e:2x2x1
jax: 0.10.0
libtpu: 0.0.40
codegen_flags: <defaults>
</compile_context>

<pallas_src>
import jax
import jax.numpy as jnp
from jax import lax
from jax.experimental import pallas as pl
from jax.experimental.pallas import tpu as pltpu

# ------------------------- model hyper-parameters (small, synthetic) --------------
B, S, H = 2, 8, 32          # batch, sequence, hidden_size
NH = 4                      # attention heads
DH = H // NH                # head dim
FFN = 64                    # intermediate size
NLAYERS = 2                 # encoder layers
VOCAB = 100                 # synthetic vocab
EPS = 1e-12                 # BERT layernorm eps
BS = B * S                  # flattened batch*seq rows
WCOLS = 3 * H + H + 2 * FFN  # packed weight-slab width: Wqkv | Wo | W1 | W2^T  = 256


# ------------------------------ in-kernel helpers ----------------------------------
def _layer_norm(x, g, b):
    mu = jnp.mean(x, axis=-1, keepdims=True)
    var = jnp.mean((x - mu) ** 2, axis=-1, keepdims=True)
    return (x - mu) * lax.rsqrt(var + EPS) * g + b


def _gelu(x):
    # tanh-approx GELU (HF BERT uses erf-GELU; numerically very close, synthetic weights)
    c = 0.7978845608028654  # sqrt(2/pi)
    return 0.5 * x * (1.0 + jnp.tanh(c * (x + 0.044715 * x * x * x)))


# --------------------- fused kernel: emb-LN + encoder stack + head ------------------
def fused_kernel(x_ref, bias_ref, embln_ref, w_ref, v_ref, hw_ref, hv_ref, out_ref):
    embln = embln_ref[...]                                  # (2, H)  gamma / beta
    x = _layer_norm(x_ref[...], embln[0:1, :], embln[1:2, :])  # (BS, H) embedding LN
    bias = bias_ref[...]                                    # (BS, BS) additive mask
    scale = 1.0 / (DH ** 0.5)

    for l in range(NLAYERS):                                # static unroll over layers
        wl = w_ref[l]                                       # (H, 256) packed weights
        vl = v_ref[l]                                       # (4, 96)  packed bias / LN

        w_qkv = wl[:, 0:3 * H]                              # (H, 3H)
        w_o = wl[:, 3 * H:4 * H]                            # (H, H)
        w_1 = wl[:, 4 * H:4 * H + FFN]                      # (H, FFN)
        w_2t = wl[:, 4 * H + FFN:4 * H + 2 * FFN]           # (H, FFN) = W2^T

        # fused QKV projection (single K=H, N=3H matmul) + fused bias add
        qkv = jnp.dot(x, w_qkv, preferred_element_type=jnp.float32) + vl[0:1, :]
        q = qkv[:, 0:H]
        k = qkv[:, H:2 * H]
        v = qkv[:, 2 * H:3 * H]

        # per-head attention; heads concatenated, then ONE output projection
        ctx = []
        for h in range(NH):
            sl = slice(h * DH, (h + 1) * DH)
            s = lax.dot_general(q[:, sl], k[:, sl], (((1,), (1,)), ((), ())),
                                preferred_element_type=jnp.float32) * scale + bias
            s = s - jnp.max(s, axis=-1, keepdims=True)
            p = jnp.exp(s)
            p = p * pl.reciprocal(jnp.sum(p, axis=-1, keepdims=True), approx=True)
            ctx.append(jnp.dot(p, v[:, sl], preferred_element_type=jnp.float32))
        ctx = jnp.concatenate(ctx, axis=1)                  # (BS, H)
        attn = jnp.dot(ctx, w_o, preferred_element_type=jnp.float32) + vl[1:2, 0:H]

        h1 = _layer_norm(x + attn, vl[1:2, H:2 * H], vl[1:2, 2 * H:3 * H])
        f = _gelu(jnp.dot(h1, w_1, preferred_element_type=jnp.float32) + vl[2:3, 0:FFN])
        f = lax.dot_general(f, w_2t, (((1,), (1,)), ((), ())),
                            preferred_element_type=jnp.float32) + vl[2:3, FFN:FFN + H]
        x = _layer_norm(h1 + f, vl[3:4, 0:H], vl[3:4, H:2 * H])

    # pooler + classifier head on the [CLS] rows (positions 0, S, 2S, ...)
    hw = hw_ref[...]                                        # (H, H) pooler weight
    hv = hv_ref[...]                                        # (3, H) pooler_b / cls_w / cls_b
    cls = jnp.concatenate([x[b * S:b * S + 1, :] for b in range(B)], axis=0)   # (B, H)
    pooled = jnp.tanh(jnp.dot(cls, hw, preferred_element_type=jnp.float32) + hv[0:1, :])
    # TODO(synk): nn.Dropout(0.4) is identity at inference; stochastic training dropout omitted.
    pred = jnp.sum(pooled * hv[1:2, :], axis=-1, keepdims=True) + hv[2:3, 0:1]  # (B, 1)
    out_ref[...] = pred


def fused_forward(x2d, attn_bias, params):
    def full(shape):
        return pl.BlockSpec(shape, lambda i, _s=shape: (0,) * len(_s))

    return pl.pallas_call(
        fused_kernel,
        out_shape=jax.ShapeDtypeStruct((B, 1), jnp.float32),
        grid=(1,),
        in_specs=[
            full((BS, H)),                 # flattened pre-LN embeddings
            full((BS, BS)),                # additive attention mask (block-diag + padding)
            full((2, H)),                  # embedding LN gamma/beta
            full((NLAYERS, H, WCOLS)),     # packed per-layer weight slab
            full((NLAYERS, 4, 3 * H)),     # packed per-layer bias / LN slab
            full((H, H)),                  # pooler weight
            full((3, H)),                  # pooler bias, cls weight (row), cls bias
        ],
        out_specs=full((B, 1)),
        compiler_params=pltpu.CompilerParams(dimension_semantics=("arbitrary",)),
    )(x2d, attn_bias, params["emb_ln"], params["w_all"], params["v_all"],
      params["head_w"], params["head_v"])


# -------------------------------- parameters ----------------------------------------
def init_params(key):
    def dense(k, shape, scale=0.02):
        return scale * jax.random.normal(k, shape, jnp.float32)

    keys = iter(jax.random.split(key, 5 + 6 * NLAYERS))
    word_emb = dense(next(keys), (VOCAB, H))
    pos_emb = dense(next(keys), (S, H))
    type_emb = dense(next(keys), (2, H))
    pooler_w = dense(next(keys), (H, H))
    cls_w = dense(next(keys), (H, 1))

    pooler_b = jnp.zeros((H,), jnp.float32)
    cls_b = jnp.zeros((1,), jnp.float32)

    w_rows, v_rows = [], []
    for _ in range(NLAYERS):
        wq = dense(next(keys), (H, H))
        wk = dense(next(keys), (H, H))
        wv = dense(next(keys), (H, H))
        wo = dense(next(keys), (H, H))
        w1 = dense(next(keys), (H, FFN))
        w2 = dense(next(keys), (FFN, H))
        bq = jnp.zeros((H,), jnp.float32); bk = jnp.zeros((H,), jnp.float32)
        bv = jnp.zeros((H,), jnp.float32); bo = jnp.zeros((H,), jnp.float32)
        g1 = jnp.ones((H,), jnp.float32); b1 = jnp.zeros((H,), jnp.float32)
        bf1 = jnp.zeros((FFN,), jnp.float32); bf2 = jnp.zeros((H,), jnp.float32)
        g2 = jnp.ones((H,), jnp.float32); b2 = jnp.zeros((H,), jnp.float32)

        # weight slab columns: [Wq|Wk|Wv | Wo | W1 | W2^T]  -> (H, 256), lane-dense
        w_rows.append(jnp.concatenate([wq, wk, wv, wo, w1, w2.T], axis=1))
        # bias/LN slab rows (width 96):
        #   row0: [bq|bk|bv]   row1: [bo|ln1_g|ln1_b]
        #   row2: [bf1(64)|bf2(32)]   row3: [ln2_g|ln2_b|0]
        v_rows.append(jnp.stack([
            jnp.concatenate([bq, bk, bv]),
            jnp.concatenate([bo, g1, b1]),
            jnp.concatenate([bf1, bf2]),
            jnp.concatenate([g2, b2, jnp.zeros((H,), jnp.float32)]),
        ]))

    return {
        "word_emb": word_emb,
        "pos_emb": pos_emb,
        "type_emb": type_emb,
        "emb_ln": jnp.stack([jnp.ones((H,), jnp.float32), jnp.zeros((H,), jnp.float32)]),
        "w_all": jnp.stack(w_rows),                               # (NLAYERS, H, 256)
        "v_all": jnp.stack(v_rows),                               # (NLAYERS, 4, 96)
        "head_w": pooler_w,                                       # (H, H)
        "head_v": jnp.stack([pooler_b, cls_w[:, 0],
                             jnp.pad(cls_b, (0, H - 1))]),        # (3, H)
    }


# -------------------------------- forward pass ---------------------------------------
def _embed(ids, params):
    # embedding-table gather stays in plain JAX (glue); LayerNorm happens in the kernel
    e = (params["word_emb"][ids]
         + params["pos_emb"][None, :, :]
         + params["type_emb"][0][None, None, :])
    return e.reshape(BS, H)


def _build_attn_bias(mask):
    # (BS, BS) additive mask: 0 where query/key are in the same batch element and the
    # key is not padded; -10000 otherwise (BERT convention).
    key_keep = mask.astype(jnp.float32).reshape(1, BS)
    batch_id = jnp.repeat(jnp.arange(B, dtype=jnp.int32), S)
    same = (batch_id[:, None] == batch_id[None, :]).astype(jnp.float32)
    return (1.0 - same * key_keep) * -10000.0


@jax.jit
def nlp_model_forward(ids, mask, params):
    x2d = _embed(ids, params)              # (B*S, H), pre-LayerNorm
    bias = _build_attn_bias(mask)          # (B*S, B*S)
    return fused_forward(x2d, bias, params)


# ------------------------------------ main --------------------------------------------
if __name__ == "__main__":
    key = jax.random.PRNGKey(0)
    pkey, ikey = jax.random.split(key)
    params = init_params(pkey)

    ids = jax.random.randint(ikey, (B, S), 0, VOCAB, dtype=jnp.int32)
    # last two positions padded, mirroring a typical HF attention_mask
    mask = jnp.concatenate(
        [jnp.ones((B, S - 2), jnp.float32), jnp.zeros((B, 2), jnp.float32)], axis=1)

    out = nlp_model_forward(ids, mask, params)
    jax.block_until_ready(out)
    assert out.shape == (B, 1) and out.dtype == jnp.float32
    print("KERNEL_OK")
</pallas_src>

<mosaic_0001>
module attributes {stable_mosaic.version = 11 : i64} {
  func.func @fused_kernel(%arg0: i32, %arg1: memref<16x32xf32, #tpu.memory_space<vmem>>, %arg2: memref<16x16xf32, #tpu.memory_space<vmem>>, %arg3: memref<2x32xf32, #tpu.memory_space<vmem>>, %arg4: memref<2x32x256xf32, #tpu.memory_space<vmem>>, %arg5: memref<2x4x96xf32, #tpu.memory_space<vmem>>, %arg6: memref<32x32xf32, #tpu.memory_space<vmem>>, %arg7: memref<3x32xf32, #tpu.memory_space<vmem>>, %arg8: memref<2x1xf32, #tpu.memory_space<vmem>>) attributes {dimension_semantics = [#tpu.dimension_semantics<arbitrary>], iteration_bounds = array<i64: 1>, scalar_prefetch = 0 : i64, scratch_operands = 0 : i64, tpu.core_type = #tpu.core_type<tc>, window_params = [{pipeline_mode = #tpu.pipeline_mode<synchronous>, transform_indices = @transform_0, window_bounds = array<i64: 16, 32>}, {pipeline_mode = #tpu.pipeline_mode<synchronous>, transform_indices = @transform_1, window_bounds = array<i64: 16, 16>}, {pipeline_mode = #tpu.pipeline_mode<synchronous>, transform_indices = @transform_2, window_bounds = array<i64: 2, 32>}, {pipeline_mode = #tpu.pipeline_mode<synchronous>, transform_indices = @transform_3, window_bounds = array<i64: 2, 32, 256>}, {pipeline_mode = #tpu.pipeline_mode<synchronous>, transform_indices = @transform_4, window_bounds = array<i64: 2, 4, 96>}, {pipeline_mode = #tpu.pipeline_mode<synchronous>, transform_indices = @transform_5, window_bounds = array<i64: 32, 32>}, {pipeline_mode = #tpu.pipeline_mode<synchronous>, transform_indices = @transform_6, window_bounds = array<i64: 3, 32>}, {pipeline_mode = #tpu.pipeline_mode<synchronous>, transform_indices = @transform_7, window_bounds = array<i64: 2, 1>}]} {
    %c0 = arith.constant 0 : index
    %c0_0 = arith.constant 0 : index
    %0 = vector.load %arg3[%c0, %c0_0] : memref<2x32xf32, #tpu.memory_space<vmem>>, vector<2x32xf32>
    %c0_1 = arith.constant 0 : index
    %c0_2 = arith.constant 0 : index
    %1 = vector.load %arg1[%c0_1, %c0_2] : memref<16x32xf32, #tpu.memory_space<vmem>>, vector<16x32xf32>
    %2 = vector.extract_strided_slice %0 {offsets = [0, 0], sizes = [1, 32], strides = [1, 1]} : vector<2x32xf32> to vector<1x32xf32>
    %3 = vector.extract_strided_slice %0 {offsets = [1, 0], sizes = [1, 32], strides = [1, 1]} : vector<2x32xf32> to vector<1x32xf32>
    %cst = arith.constant dense<0.000000e+00> : vector<16xf32>
    %4 = vector.multi_reduction <add>, %1, %cst [1] : vector<16x32xf32> to vector<16xf32>
    %5 = vector.shape_cast %4 : vector<16xf32> to vector<16x1xf32>
    %cst_3 = arith.constant 3.200000e+01 : f32
    %6 = vector.broadcast %cst_3 : f32 to vector<16x1xf32>
    %7 = arith.divf %5, %6 : vector<16x1xf32>
    %8 = vector.broadcast %7 : vector<16x1xf32> to vector<16x32xf32>
    %9 = arith.subf %1, %8 : vector<16x32xf32>
    %10 = arith.mulf %9, %9 : vector<16x32xf32>
    %cst_4 = arith.constant dense<0.000000e+00> : vector<16xf32>
    %11 = vector.multi_reduction <add>, %10, %cst_4 [1] : vector<16x32xf32> to vector<16xf32>
    %12 = vector.shape_cast %11 : vector<16xf32> to vector<16x1xf32>
    %cst_5 = arith.constant 3.200000e+01 : f32
    %13 = vector.broadcast %cst_5 : f32 to vector<16x1xf32>
    %14 = arith.divf %12, %13 : vector<16x1xf32>
    %15 = vector.broadcast %7 : vector<16x1xf32> to vector<16x32xf32>
    %16 = arith.subf %1, %15 : vector<16x32xf32>
    %cst_6 = arith.constant 9.99999996E-13 : f32
    %17 = vector.broadcast %cst_6 : f32 to vector<16x1xf32>
    %18 = arith.addf %14, %17 : vector<16x1xf32>
    %19 = math.rsqrt %18 : vector<16x1xf32>
    %20 = vector.broadcast %19 : vector<16x1xf32> to vector<16x32xf32>
    %21 = arith.mulf %16, %20 : vector<16x32xf32>
    %22 = vector.broadcast %2 : vector<1x32xf32> to vector<16x32xf32>
    %23 = arith.mulf %21, %22 : vector<16x32xf32>
    %24 = vector.broadcast %3 : vector<1x32xf32> to vector<16x32xf32>
    %25 = arith.addf %23, %24 : vector<16x32xf32>
    %c0_7 = arith.constant 0 : index
    %c0_8 = arith.constant 0 : index
    %26 = vector.load %arg2[%c0_7, %c0_8] : memref<16x16xf32, #tpu.memory_space<vmem>>, vector<16x16xf32>
    %c0_9 = arith.constant 0 : index
    %c0_10 = arith.constant 0 : index
    %c0_11 = arith.constant 0 : index
    %27 = vector.load %arg4[%c0_9, %c0_10, %c0_11] : memref<2x32x256xf32, #tpu.memory_space<vmem>>, vector<1x32x256xf32>
    %28 = vector.shape_cast %27 : vector<1x32x256xf32> to vector<32x256xf32>
    %c0_12 = arith.constant 0 : index
    %c0_13 = arith.constant 0 : index
    %c0_14 = arith.constant 0 : index
    %29 = vector.load %arg5[%c0_12, %c0_13, %c0_14] : memref<2x4x96xf32, #tpu.memory_space<vmem>>, vector<1x4x96xf32>
    %30 = vector.shape_cast %29 : vector<1x4x96xf32> to vector<4x96xf32>
    %31 = vector.extract_strided_slice %28 {offsets = [0, 0], sizes = [32, 96], strides = [1, 1]} : vector<32x256xf32> to vector<32x96xf32>
    %32 = vector.extract_strided_slice %28 {offsets = [0, 96], sizes = [32, 32], strides = [1, 1]} : vector<32x256xf32> to vector<32x32xf32>
    %33 = vector.extract_strided_slice %28 {offsets = [0, 128], sizes = [32, 64], strides = [1, 1]} : vector<32x256xf32> to vector<32x64xf32>
    %34 = vector.extract_strided_slice %28 {offsets = [0, 192], sizes = [32, 64], strides = [1, 1]} : vector<32x256xf32> to vector<32x64xf32>
    %cst_15 = arith.constant dense<0.000000e+00> : vector<16x96xf32>
    %35 = tpu.matmul %25, %31, %cst_15 {dimension_numbers = #tpu.dot_dimension_numbers<[1], [0], [0], [1], [0, 0, 1, 1], [], []>} : vector<16x32xf32>, vector<32x96xf32>, vector<16x96xf32> -> vector<16x96xf32>
    %36 = vector.extract_strided_slice %30 {offsets = [0, 0], sizes = [1, 96], strides = [1, 1]} : vector<4x96xf32> to vector<1x96xf32>
    %37 = vector.broadcast %36 : vector<1x96xf32> to vector<16x96xf32>
    %38 = arith.addf %35, %37 : vector<16x96xf32>
    %39 = vector.extract_strided_slice %38 {offsets = [0, 0], sizes = [16, 32], strides = [1, 1]} : vector<16x96xf32> to vector<16x32xf32>
    %40 = vector.extract_strided_slice %38 {offsets = [0, 32], sizes = [16, 32], strides = [1, 1]} : vector<16x96xf32> to vector<16x32xf32>
    %41 = vector.extract_strided_slice %38 {offsets = [0, 64], sizes = [16, 32], strides = [1, 1]} : vector<16x96xf32> to vector<16x32xf32>
    %42 = vector.extract_strided_slice %39 {offsets = [0, 0], sizes = [16, 8], strides = [1, 1]} : vector<16x32xf32> to vector<16x8xf32>
    %43 = vector.extract_strided_slice %40 {offsets = [0, 0], sizes = [16, 8], strides = [1, 1]} : vector<16x32xf32> to vector<16x8xf32>
    %cst_16 = arith.constant dense<0.000000e+00> : vector<16x16xf32>
    %44 = tpu.matmul %42, %43, %cst_16 {dimension_numbers = #tpu.dot_dimension_numbers<[1], [1], [0], [0], [0, 0, 1, 0], [], []>} : vector<16x8xf32>, vector<16x8xf32>, vector<16x16xf32> -> vector<16x16xf32>
    %cst_17 = arith.constant 0.353553385 : f32
    %45 = vector.broadcast %cst_17 : f32 to vector<16x16xf32>
    %46 = arith.mulf %44, %45 : vector<16x16xf32>
    %47 = arith.addf %46, %26 : vector<16x16xf32>
    %cst_18 = arith.constant dense<0xFF800000> : vector<16xf32>
    %48 = vector.multi_reduction <maximumf>, %47, %cst_18 [1] : vector<16x16xf32> to vector<16xf32>
    %49 = vector.shape_cast %48 : vector<16xf32> to vector<16x1xf32>
    %50 = vector.broadcast %49 : vector<16x1xf32> to vector<16x16xf32>
    %51 = arith.subf %47, %50 : vector<16x16xf32>
    %52 = math.exp %51 : vector<16x16xf32>
    %cst_19 = arith.constant dense<0.000000e+00> : vector<16xf32>
    %53 = vector.multi_reduction <add>, %52, %cst_19 [1] : vector<16x16xf32> to vector<16xf32>
    %54 = vector.shape_cast %53 : vector<16xf32> to vector<16x1xf32>
    %55 = tpu.reciprocal %54 {approx = true} : vector<16x1xf32> -> vector<16x1xf32>
    %56 = vector.broadcast %55 : vector<16x1xf32> to vector<16x16xf32>
    %57 = arith.mulf %52, %56 : vector<16x16xf32>
    %58 = vector.extract_strided_slice %41 {offsets = [0, 0], sizes = [16, 8], strides = [1, 1]} : vector<16x32xf32> to vector<16x8xf32>
    %cst_20 = arith.constant dense<0.000000e+00> : vector<16x8xf32>
    %59 = tpu.matmul %57, %58, %cst_20 {dimension_numbers = #tpu.dot_dimension_numbers<[1], [0], [0], [1], [0, 0, 1, 1], [], []>} : vector<16x16xf32>, vector<16x8xf32>, vector<16x8xf32> -> vector<16x8xf32>
    %60 = vector.extract_strided_slice %39 {offsets = [0, 8], sizes = [16, 8], strides = [1, 1]} : vector<16x32xf32> to vector<16x8xf32>
    %61 = vector.extract_strided_slice %40 {offsets = [0, 8], sizes = [16, 8], strides = [1, 1]} : vector<16x32xf32> to vector<16x8xf32>
    %cst_21 = arith.constant dense<0.000000e+00> : vector<16x16xf32>
    %62 = tpu.matmul %60, %61, %cst_21 {dimension_numbers = #tpu.dot_dimension_numbers<[1], [1], [0], [0], [0, 0, 1, 0], [], []>} : vector<16x8xf32>, vector<16x8xf32>, vector<16x16xf32> -> vector<16x16xf32>
    %cst_22 = arith.constant 0.353553385 : f32
    %63 = vector.broadcast %cst_22 : f32 to vector<16x16xf32>
    %64 = arith.mulf %62, %63 : vector<16x16xf32>
    %65 = arith.addf %64, %26 : vector<16x16xf32>
    %cst_23 = arith.constant dense<0xFF800000> : vector<16xf32>
    %66 = vector.multi_reduction <maximumf>, %65, %cst_23 [1] : vector<16x16xf32> to vector<16xf32>
    %67 = vector.shape_cast %66 : vector<16xf32> to vector<16x1xf32>
    %68 = vector.broadcast %67 : vector<16x1xf32> to vector<16x16xf32>
    %69 = arith.subf %65, %68 : vector<16x16xf32>
    %70 = math.exp %69 : vector<16x16xf32>
    %cst_24 = arith.constant dense<0.000000e+00> : vector<16xf32>
    %71 = vector.multi_reduction <add>, %70, %cst_24 [1] : vector<16x16xf32> to vector<16xf32>
    %72 = vector.shape_cast %71 : vector<16xf32> to vector<16x1xf32>
    %73 = tpu.reciprocal %72 {approx = true} : vector<16x1xf32> -> vector<16x1xf32>
    %74 = vector.broadcast %73 : vector<16x1xf32> to vector<16x16xf32>
    %75 = arith.mulf %70, %74 : vector<16x16xf32>
    %76 = vector.extract_strided_slice %41 {offsets = [0, 8], sizes = [16, 8], strides = [1, 1]} : vector<16x32xf32> to vector<16x8xf32>
    %cst_25 = arith.constant dense<0.000000e+00> : vector<16x8xf32>
    %77 = tpu.matmul %75, %76, %cst_25 {dimension_numbers = #tpu.dot_dimension_numbers<[1], [0], [0], [1], [0, 0, 1, 1], [], []>} : vector<16x16xf32>, vector<16x8xf32>, vector<16x8xf32> -> vector<16x8xf32>
    %78 = vector.extract_strided_slice %39 {offsets = [0, 16], sizes = [16, 8], strides = [1, 1]} : vector<16x32xf32> to vector<16x8xf32>
    %79 = vector.extract_strided_slice %40 {offsets = [0, 16], sizes = [16, 8], strides = [1, 1]} : vector<16x32xf32> to vector<16x8xf32>
    %cst_26 = arith.constant dense<0.000000e+00> : vector<16x16xf32>
    %80 = tpu.matmul %78, %79, %cst_26 {dimension_numbers = #tpu.dot_dimension_numbers<[1], [1], [0], [0], [0, 0, 1, 0], [], []>} : vector<16x8xf32>, vector<16x8xf32>, vector<16x16xf32> -> vector<16x16xf32>
    %cst_27 = arith.constant 0.353553385 : f32
    %81 = vector.broadcast %cst_27 : f32 to vector<16x16xf32>
    %82 = arith.mulf %80, %81 : vector<16x16xf32>
    %83 = arith.addf %82, %26 : vector<16x16xf32>
    %cst_28 = arith.constant dense<0xFF800000> : vector<16xf32>
    %84 = vector.multi_reduction <maximumf>, %83, %cst_28 [1] : vector<16x16xf32> to vector<16xf32>
    %85 = vector.shape_cast %84 : vector<16xf32> to vector<16x1xf32>
    %86 = vector.broadcast %85 : vector<16x1xf32> to vector<16x16xf32>
    %87 = arith.subf %83, %86 : vector<16x16xf32>
    %88 = math.exp %87 : vector<16x16xf32>
    %cst_29 = arith.constant dense<0.000000e+00> : vector<16xf32>
    %89 = vector.multi_reduction <add>, %88, %cst_29 [1] : vector<16x16xf32> to vector<16xf32>
    %90 = vector.shape_cast %89 : vector<16xf32> to vector<16x1xf32>
    %91 = tpu.reciprocal %90 {approx = true} : vector<16x1xf32> -> vector<16x1xf32>
    %92 = vector.broadcast %91 : vector<16x1xf32> to vector<16x16xf32>
    %93 = arith.mulf %88, %92 : vector<16x16xf32>
    %94 = vector.extract_strided_slice %41 {offsets = [0, 16], sizes = [16, 8], strides = [1, 1]} : vector<16x32xf32> to vector<16x8xf32>
    %cst_30 = arith.constant dense<0.000000e+00> : vector<16x8xf32>
    %95 = tpu.matmul %93, %94, %cst_30 {dimension_numbers = #tpu.dot_dimension_numbers<[1], [0], [0], [1], [0, 0, 1, 1], [], []>} : vector<16x16xf32>, vector<16x8xf32>, vector<16x8xf32> -> vector<16x8xf32>
    %96 = vector.extract_strided_slice %39 {offsets = [0, 24], sizes = [16, 8], strides = [1, 1]} : vector<16x32xf32> to vector<16x8xf32>
    %97 = vector.extract_strided_slice %40 {offsets = [0, 24], sizes = [16, 8], strides = [1, 1]} : vector<16x32xf32> to vector<16x8xf32>
    %cst_31 = arith.constant dense<0.000000e+00> : vector<16x16xf32>
    %98 = tpu.matmul %96, %97, %cst_31 {dimension_numbers = #tpu.dot_dimension_numbers<[1], [1], [0], [0], [0, 0, 1, 0], [], []>} : vector<16x8xf32>, vector<16x8xf32>, vector<16x16xf32> -> vector<16x16xf32>
    %cst_32 = arith.constant 0.353553385 : f32
    %99 = vector.broadcast %cst_32 : f32 to vector<16x16xf32>
    %100 = arith.mulf %98, %99 : vector<16x16xf32>
    %101 = arith.addf %100, %26 : vector<16x16xf32>
    %cst_33 = arith.constant dense<0xFF800000> : vector<16xf32>
    %102 = vector.multi_reduction <maximumf>, %101, %cst_33 [1] : vector<16x16xf32> to vector<16xf32>
    %103 = vector.shape_cast %102 : vector<16xf32> to vector<16x1xf32>
    %104 = vector.broadcast %103 : vector<16x1xf32> to vector<16x16xf32>
    %105 = arith.subf %101, %104 : vector<16x16xf32>
    %106 = math.exp %105 : vector<16x16xf32>
    %cst_34 = arith.constant dense<0.000000e+00> : vector<16xf32>
    %107 = vector.multi_reduction <add>, %106, %cst_34 [1] : vector<16x16xf32> to vector<16xf32>
    %108 = vector.shape_cast %107 : vector<16xf32> to vector<16x1xf32>
    %109 = tpu.reciprocal %108 {approx = true} : vector<16x1xf32> -> vector<16x1xf32>
    %110 = vector.broadcast %109 : vector<16x1xf32> to vector<16x16xf32>
    %111 = arith.mulf %106, %110 : vector<16x16xf32>
    %112 = vector.extract_strided_slice %41 {offsets = [0, 24], sizes = [16, 8], strides = [1, 1]} : vector<16x32xf32> to vector<16x8xf32>
    %cst_35 = arith.constant dense<0.000000e+00> : vector<16x8xf32>
    %113 = tpu.matmul %111, %112, %cst_35 {dimension_numbers = #tpu.dot_dimension_numbers<[1], [0], [0], [1], [0, 0, 1, 1], [], []>} : vector<16x16xf32>, vector<16x8xf32>, vector<16x8xf32> -> vector<16x8xf32>
    %114 = tpu.concatenate %59, %77, %95, %113 in 1 : vector<16x8xf32>, vector<16x8xf32>, vector<16x8xf32>, vector<16x8xf32> -> vector<16x32xf32>
    %cst_36 = arith.constant dense<0.000000e+00> : vector<16x32xf32>
    %115 = tpu.matmul %114, %32, %cst_36 {dimension_numbers = #tpu.dot_dimension_numbers<[1], [0], [0], [1], [0, 0, 1, 1], [], []>} : vector<16x32xf32>, vector<32x32xf32>, vector<16x32xf32> -> vector<16x32xf32>
    %116 = vector.extract_strided_slice %30 {offsets = [1, 0], sizes = [1, 32], strides = [1, 1]} : vector<4x96xf32> to vector<1x32xf32>
    %117 = vector.broadcast %116 : vector<1x32xf32> to vector<16x32xf32>
    %118 = arith.addf %115, %117 : vector<16x32xf32>
    %119 = arith.addf %25, %118 : vector<16x32xf32>
    %120 = vector.extract_strided_slice %30 {offsets = [1, 32], sizes = [1, 32], strides = [1, 1]} : vector<4x96xf32> to vector<1x32xf32>
    %121 = vector.extract_strided_slice %30 {offsets = [1, 64], sizes = [1, 32], strides = [1, 1]} : vector<4x96xf32> to vector<1x32xf32>
    %cst_37 = arith.constant dense<0.000000e+00> : vector<16xf32>
    %122 = vector.multi_reduction <add>, %119, %cst_37 [1] : vector<16x32xf32> to vector<16xf32>
    %123 = vector.shape_cast %122 : vector<16xf32> to vector<16x1xf32>
    %cst_38 = arith.constant 3.200000e+01 : f32
    %124 = vector.broadcast %cst_38 : f32 to vector<16x1xf32>
    %125 = arith.divf %123, %124 : vector<16x1xf32>
    %126 = vector.broadcast %125 : vector<16x1xf32> to vector<16x32xf32>
    %127 = arith.subf %119, %126 : vector<16x32xf32>
    %128 = arith.mulf %127, %127 : vector<16x32xf32>
    %cst_39 = arith.constant dense<0.000000e+00> : vector<16xf32>
    %129 = vector.multi_reduction <add>, %128, %cst_39 [1] : vector<16x32xf32> to vector<16xf32>
    %130 = vector.shape_cast %129 : vector<16xf32> to vector<16x1xf32>
    %cst_40 = arith.constant 3.200000e+01 : f32
    %131 = vector.broadcast %cst_40 : f32 to vector<16x1xf32>
    %132 = arith.divf %130, %131 : vector<16x1xf32>
    %133 = vector.broadcast %125 : vector<16x1xf32> to vector<16x32xf32>
    %134 = arith.subf %119, %133 : vector<16x32xf32>
    %cst_41 = arith.constant 9.99999996E-13 : f32
    %135 = vector.broadcast %cst_41 : f32 to vector<16x1xf32>
    %136 = arith.addf %132, %135 : vector<16x1xf32>
    %137 = math.rsqrt %136 : vector<16x1xf32>
    %138 = vector.broadcast %137 : vector<16x1xf32> to vector<16x32xf32>
    %139 = arith.mulf %134, %138 : vector<16x32xf32>
    %140 = vector.broadcast %120 : vector<1x32xf32> to vector<16x32xf32>
    %141 = arith.mulf %139, %140 : vector<16x32xf32>
    %142 = vector.broadcast %121 : vector<1x32xf32> to vector<16x32xf32>
    %143 = arith.addf %141, %142 : vector<16x32xf32>
    %cst_42 = arith.constant dense<0.000000e+00> : vector<16x64xf32>
    %144 = tpu.matmul %143, %33, %cst_42 {dimension_numbers = #tpu.dot_dimension_numbers<[1], [0], [0], [1], [0, 0, 1, 1], [], []>} : vector<16x32xf32>, vector<32x64xf32>, vector<16x64xf32> -> vector<16x64xf32>
    %145 = vector.extract_strided_slice %30 {offsets = [2, 0], sizes = [1, 64], strides = [1, 1]} : vector<4x96xf32> to vector<1x64xf32>
    %146 = vector.broadcast %145 : vector<1x64xf32> to vector<16x64xf32>
    %147 = arith.addf %144, %146 : vector<16x64xf32>
    %cst_43 = arith.constant 5.000000e-01 : f32
    %148 = vector.broadcast %cst_43 : f32 to vector<16x64xf32>
    %149 = arith.mulf %148, %147 : vector<16x64xf32>
    %cst_44 = arith.constant 4.471500e-02 : f32
    %150 = vector.broadcast %cst_44 : f32 to vector<16x64xf32>
    %151 = arith.mulf %150, %147 : vector<16x64xf32>
    %152 = arith.mulf %151, %147 : vector<16x64xf32>
    %153 = arith.mulf %152, %147 : vector<16x64xf32>
    %154 = arith.addf %147, %153 : vector<16x64xf32>
    %cst_45 = arith.constant 0.797884583 : f32
    %155 = vector.broadcast %cst_45 : f32 to vector<16x64xf32>
    %156 = arith.mulf %155, %154 : vector<16x64xf32>
    %157 = math.tanh %156 : vector<16x64xf32>
    %cst_46 = arith.constant 1.000000e+00 : f32
    %158 = vector.broadcast %cst_46 : f32 to vector<16x64xf32>
    %159 = arith.addf %158, %157 : vector<16x64xf32>
    %160 = arith.mulf %149, %159 : vector<16x64xf32>
    %cst_47 = arith.constant dense<0.000000e+00> : vector<16x32xf32>
    %161 = tpu.matmul %160, %34, %cst_47 {dimension_numbers = #tpu.dot_dimension_numbers<[1], [1], [0], [0], [0, 0, 1, 0], [], []>} : vector<16x64xf32>, vector<32x64xf32>, vector<16x32xf32> -> vector<16x32xf32>
    %162 = vector.extract_strided_slice %30 {offsets = [2, 64], sizes = [1, 32], strides = [1, 1]} : vector<4x96xf32> to vector<1x32xf32>
    %163 = vector.broadcast %162 : vector<1x32xf32> to vector<16x32xf32>
    %164 = arith.addf %161, %163 : vector<16x32xf32>
    %165 = arith.addf %143, %164 : vector<16x32xf32>
    %166 = vector.extract_strided_slice %30 {offsets = [3, 0], sizes = [1, 32], strides = [1, 1]} : vector<4x96xf32> to vector<1x32xf32>
    %167 = vector.extract_strided_slice %30 {offsets = [3, 32], sizes = [1, 32], strides = [1, 1]} : vector<4x96xf32> to vector<1x32xf32>
    %cst_48 = arith.constant dense<0.000000e+00> : vector<16xf32>
    %168 = vector.multi_reduction <add>, %165, %cst_48 [1] : vector<16x32xf32> to vector<16xf32>
    %169 = vector.shape_cast %168 : vector<16xf32> to vector<16x1xf32>
    %cst_49 = arith.constant 3.200000e+01 : f32
    %170 = vector.broadcast %cst_49 : f32 to vector<16x1xf32>
    %171 = arith.divf %169, %170 : vector<16x1xf32>
    %172 = vector.broadcast %171 : vector<16x1xf32> to vector<16x32xf32>
    %173 = arith.subf %165, %172 : vector<16x32xf32>
    %174 = arith.mulf %173, %173 : vector<16x32xf32>
    %cst_50 = arith.constant dense<0.000000e+00> : vector<16xf32>
    %175 = vector.multi_reduction <add>, %174, %cst_50 [1] : vector<16x32xf32> to vector<16xf32>
    %176 = vector.shape_cast %175 : vector<16xf32> to vector<16x1xf32>
    %cst_51 = arith.constant 3.200000e+01 : f32
    %177 = vector.broadcast %cst_51 : f32 to vector<16x1xf32>
    %178 = arith.divf %176, %177 : vector<16x1xf32>
    %179 = vector.broadcast %171 : vector<16x1xf32> to vector<16x32xf32>
    %180 = arith.subf %165, %179 : vector<16x32xf32>
    %cst_52 = arith.constant 9.99999996E-13 : f32
    %181 = vector.broadcast %cst_52 : f32 to vector<16x1xf32>
    %182 = arith.addf %178, %181 : vector<16x1xf32>
    %183 = math.rsqrt %182 : vector<16x1xf32>
    %184 = vector.broadcast %183 : vector<16x1xf32> to vector<16x32xf32>
    %185 = arith.mulf %180, %184 : vector<16x32xf32>
    %186 = vector.broadcast %166 : vector<1x32xf32> to vector<16x32xf32>
    %187 = arith.mulf %185, %186 : vector<16x32xf32>
    %188 = vector.broadcast %167 : vector<1x32xf32> to vector<16x32xf32>
    %189 = arith.addf %187, %188 : vector<16x32xf32>
    %c1 = arith.constant 1 : index
    %c0_53 = arith.constant 0 : index
    %c0_54 = arith.constant 0 : index
    %190 = vector.load %arg4[%c1, %c0_53, %c0_54] : memref<2x32x256xf32, #tpu.memory_space<vmem>>, vector<1x32x256xf32>
    %191 = vector.shape_cast %190 : vector<1x32x256xf32> to vector<32x256xf32>
    %c1_55 = arith.constant 1 : index
    %c0_56 = arith.constant 0 : index
    %c0_57 = arith.constant 0 : index
    %192 = vector.load %arg5[%c1_55, %c0_56, %c0_57] : memref<2x4x96xf32, #tpu.memory_space<vmem>>, vector<1x4x96xf32>
    %193 = vector.shape_cast %192 : vector<1x4x96xf32> to vector<4x96xf32>
    %194 = vector.extract_strided_slice %191 {offsets = [0, 0], sizes = [32, 96], strides = [1, 1]} : vector<32x256xf32> to vector<32x96xf32>
    %195 = vector.extract_strided_slice %191 {offsets = [0, 96], sizes = [32, 32], strides = [1, 1]} : vector<32x256xf32> to vector<32x32xf32>
    %196 = vector.extract_strided_slice %191 {offsets = [0, 128], sizes = [32, 64], strides = [1, 1]} : vector<32x256xf32> to vector<32x64xf32>
    %197 = vector.extract_strided_slice %191 {offsets = [0, 192], sizes = [32, 64], strides = [1, 1]} : vector<32x256xf32> to vector<32x64xf32>
    %cst_58 = arith.constant dense<0.000000e+00> : vector<16x96xf32>
    %198 = tpu.matmul %189, %194, %cst_58 {dimension_numbers = #tpu.dot_dimension_numbers<[1], [0], [0], [1], [0, 0, 1, 1], [], []>} : vector<16x32xf32>, vector<32x96xf32>, vector<16x96xf32> -> vector<16x96xf32>
    %199 = vector.extract_strided_slice %193 {offsets = [0, 0], sizes = [1, 96], strides = [1, 1]} : vector<4x96xf32> to vector<1x96xf32>
    %200 = vector.broadcast %199 : vector<1x96xf32> to vector<16x96xf32>
    %201 = arith.addf %198, %200 : vector<16x96xf32>
    %202 = vector.extract_strided_slice %201 {offsets = [0, 0], sizes = [16, 32], strides = [1, 1]} : vector<16x96xf32> to vector<16x32xf32>
    %203 = vector.extract_strided_slice %201 {offsets = [0, 32], sizes = [16, 32], strides = [1, 1]} : vector<16x96xf32> to vector<16x32xf32>
    %204 = vector.extract_strided_slice %201 {offsets = [0, 64], sizes = [16, 32], strides = [1, 1]} : vector<16x96xf32> to vector<16x32xf32>
    %205 = vector.extract_strided_slice %202 {offsets = [0, 0], sizes = [16, 8], strides = [1, 1]} : vector<16x32xf32> to vector<16x8xf32>
    %206 = vector.extract_strided_slice %203 {offsets = [0, 0], sizes = [16, 8], strides = [1, 1]} : vector<16x32xf32> to vector<16x8xf32>
    %cst_59 = arith.constant dense<0.000000e+00> : vector<16x16xf32>
    %207 = tpu.matmul %205, %206, %cst_59 {dimension_numbers = #tpu.dot_dimension_numbers<[1], [1], [0], [0], [0, 0, 1, 0], [], []>} : vector<16x8xf32>, vector<16x8xf32>, vector<16x16xf32> -> vector<16x16xf32>
    %cst_60 = arith.constant 0.353553385 : f32
    %208 = vector.broadcast %cst_60 : f32 to vector<16x16xf32>
    %209 = arith.mulf %207, %208 : vector<16x16xf32>
    %210 = arith.addf %209, %26 : vector<16x16xf32>
    %cst_61 = arith.constant dense<0xFF800000> : vector<16xf32>
    %211 = vector.multi_reduction <maximumf>, %210, %cst_61 [1] : vector<16x16xf32> to vector<16xf32>
    %212 = vector.shape_cast %211 : vector<16xf32> to vector<16x1xf32>
    %213 = vector.broadcast %212 : vector<16x1xf32> to vector<16x16xf32>
    %214 = arith.subf %210, %213 : vector<16x16xf32>
    %215 = math.exp %214 : vector<16x16xf32>
    %cst_62 = arith.constant dense<0.000000e+00> : vector<16xf32>
    %216 = vector.multi_reduction <add>, %215, %cst_62 [1] : vector<16x16xf32> to vector<16xf32>
    %217 = vector.shape_cast %216 : vector<16xf32> to vector<16x1xf32>
    %218 = tpu.reciprocal %217 {approx = true} : vector<16x1xf32> -> vector<16x1xf32>
    %219 = vector.broadcast %218 : vector<16x1xf32> to vector<16x16xf32>
    %220 = arith.mulf %215, %219 : vector<16x16xf32>
    %221 = vector.extract_strided_slice %204 {offsets = [0, 0], sizes = [16, 8], strides = [1, 1]} : vector<16x32xf32> to vector<16x8xf32>
    %cst_63 = arith.constant dense<0.000000e+00> : vector<16x8xf32>
    %222 = tpu.matmul %220, %221, %cst_63 {dimension_numbers = #tpu.dot_dimension_numbers<[1], [0], [0], [1], [0, 0, 1, 1], [], []>} : vector<16x16xf32>, vector<16x8xf32>, vector<16x8xf32> -> vector<16x8xf32>
    %223 = vector.extract_strided_slice %202 {offsets = [0, 8], sizes = [16, 8], strides = [1, 1]} : vector<16x32xf32> to vector<16x8xf32>
    %224 = vector.extract_strided_slice %203 {offsets = [0, 8], sizes = [16, 8], strides = [1, 1]} : vector<16x32xf32> to vector<16x8xf32>
    %cst_64 = arith.constant dense<0.000000e+00> : vector<16x16xf32>
    %225 = tpu.matmul %223, %224, %cst_64 {dimension_numbers = #tpu.dot_dimension_numbers<[1], [1], [0], [0], [0, 0, 1, 0], [], []>} : vector<16x8xf32>, vector<16x8xf32>, vector<16x16xf32> -> vector<16x16xf32>
    %cst_65 = arith.constant 0.353553385 : f32
    %226 = vector.broadcast %cst_65 : f32 to vector<16x16xf32>
    %227 = arith.mulf %225, %226 : vector<16x16xf32>
    %228 = arith.addf %227, %26 : vector<16x16xf32>
    %cst_66 = arith.constant dense<0xFF800000> : vector<16xf32>
    %229 = vector.multi_reduction <maximumf>, %228, %cst_66 [1] : vector<16x16xf32> to vector<16xf32>
    %230 = vector.shape_cast %229 : vector<16xf32> to vector<16x1xf32>
    %231 = vector.broadcast %230 : vector<16x1xf32> to vector<16x16xf32>
    %232 = arith.subf %228, %231 : vector<16x16xf32>
    %233 = math.exp %232 : vector<16x16xf32>
    %cst_67 = arith.constant dense<0.000000e+00> : vector<16xf32>
    %234 = vector.multi_reduction <add>, %233, %cst_67 [1] : vector<16x16xf32> to vector<16xf32>
    %235 = vector.shape_cast %234 : vector<16xf32> to vector<16x1xf32>
    %236 = tpu.reciprocal %235 {approx = true} : vector<16x1xf32> -> vector<16x1xf32>
    %237 = vector.broadcast %236 : vector<16x1xf32> to vector<16x16xf32>
    %238 = arith.mulf %233, %237 : vector<16x16xf32>
    %239 = vector.extract_strided_slice %204 {offsets = [0, 8], sizes = [16, 8], strides = [1, 1]} : vector<16x32xf32> to vector<16x8xf32>
    %cst_68 = arith.constant dense<0.000000e+00> : vector<16x8xf32>
    %240 = tpu.matmul %238, %239, %cst_68 {dimension_numbers = #tpu.dot_dimension_numbers<[1], [0], [0], [1], [0, 0, 1, 1], [], []>} : vector<16x16xf32>, vector<16x8xf32>, vector<16x8xf32> -> vector<16x8xf32>
    %241 = vector.extract_strided_slice %202 {offsets = [0, 16], sizes = [16, 8], strides = [1, 1]} : vector<16x32xf32> to vector<16x8xf32>
    %242 = vector.extract_strided_slice %203 {offsets = [0, 16], sizes = [16, 8], strides = [1, 1]} : vector<16x32xf32> to vector<16x8xf32>
    %cst_69 = arith.constant dense<0.000000e+00> : vector<16x16xf32>
    %243 = tpu.matmul %241, %242, %cst_69 {dimension_numbers = #tpu.dot_dimension_numbers<[1], [1], [0], [0], [0, 0, 1, 0], [], []>} : vector<16x8xf32>, vector<16x8xf32>, vector<16x16xf32> -> vector<16x16xf32>
    %cst_70 = arith.constant 0.353553385 : f32
    %244 = vector.broadcast %cst_70 : f32 to vector<16x16xf32>
    %245 = arith.mulf %243, %244 : vector<16x16xf32>
    %246 = arith.addf %245, %26 : vector<16x16xf32>
    %cst_71 = arith.constant dense<0xFF800000> : vector<16xf32>
    %247 = vector.multi_reduction <maximumf>, %246, %cst_71 [1] : vector<16x16xf32> to vector<16xf32>
    %248 = vector.shape_cast %247 : vector<16xf32> to vector<16x1xf32>
    %249 = vector.broadcast %248 : vector<16x1xf32> to vector<16x16xf32>
    %250 = arith.subf %246, %249 : vector<16x16xf32>
    %251 = math.exp %250 : vector<16x16xf32>
    %cst_72 = arith.constant dense<0.000000e+00> : vector<16xf32>
    %252 = vector.multi_reduction <add>, %251, %cst_72 [1] : vector<16x16xf32> to vector<16xf32>
    %253 = vector.shape_cast %252 : vector<16xf32> to vector<16x1xf32>
    %254 = tpu.reciprocal %253 {approx = true} : vector<16x1xf32> -> vector<16x1xf32>
    %255 = vector.broadcast %254 : vector<16x1xf32> to vector<16x16xf32>
    %256 = arith.mulf %251, %255 : vector<16x16xf32>
    %257 = vector.extract_strided_slice %204 {offsets = [0, 16], sizes = [16, 8], strides = [1, 1]} : vector<16x32xf32> to vector<16x8xf32>
    %cst_73 = arith.constant dense<0.000000e+00> : vector<16x8xf32>
    %258 = tpu.matmul %256, %257, %cst_73 {dimension_numbers = #tpu.dot_dimension_numbers<[1], [0], [0], [1], [0, 0, 1, 1], [], []>} : vector<16x16xf32>, vector<16x8xf32>, vector<16x8xf32> -> vector<16x8xf32>
    %259 = vector.extract_strided_slice %202 {offsets = [0, 24], sizes = [16, 8], strides = [1, 1]} : vector<16x32xf32> to vector<16x8xf32>
    %260 = vector.extract_strided_slice %203 {offsets = [0, 24], sizes = [16, 8], strides = [1, 1]} : vector<16x32xf32> to vector<16x8xf32>
    %cst_74 = arith.constant dense<0.000000e+00> : vector<16x16xf32>
    %261 = tpu.matmul %259, %260, %cst_74 {dimension_numbers = #tpu.dot_dimension_numbers<[1], [1], [0], [0], [0, 0, 1, 0], [], []>} : vector<16x8xf32>, vector<16x8xf32>, vector<16x16xf32> -> vector<16x16xf32>
    %cst_75 = arith.constant 0.353553385 : f32
    %262 = vector.broadcast %cst_75 : f32 to vector<16x16xf32>
    %263 = arith.mulf %261, %262 : vector<16x16xf32>
    %264 = arith.addf %263, %26 : vector<16x16xf32>
    %cst_76 = arith.constant dense<0xFF800000> : vector<16xf32>
    %265 = vector.multi_reduction <maximumf>, %264, %cst_76 [1] : vector<16x16xf32> to vector<16xf32>
    %266 = vector.shape_cast %265 : vector<16xf32> to vector<16x1xf32>
    %267 = vector.broadcast %266 : vector<16x1xf32> to vector<16x16xf32>
    %268 = arith.subf %264, %267 : vector<16x16xf32>
    %269 = math.exp %268 : vector<16x16xf32>
    %cst_77 = arith.constant dense<0.000000e+00> : vector<16xf32>
    %270 = vector.multi_reduction <add>, %269, %cst_77 [1] : vector<16x16xf32> to vector<16xf32>
    %271 = vector.shape_cast %270 : vector<16xf32> to vector<16x1xf32>
    %272 = tpu.reciprocal %271 {approx = true} : vector<16x1xf32> -> vector<16x1xf32>
    %273 = vector.broadcast %272 : vector<16x1xf32> to vector<16x16xf32>
    %274 = arith.mulf %269, %273 : vector<16x16xf32>
    %275 = vector.extract_strided_slice %204 {offsets = [0, 24], sizes = [16, 8], strides = [1, 1]} : vector<16x32xf32> to vector<16x8xf32>
    %cst_78 = arith.constant dense<0.000000e+00> : vector<16x8xf32>
    %276 = tpu.matmul %274, %275, %cst_78 {dimension_numbers = #tpu.dot_dimension_numbers<[1], [0], [0], [1], [0, 0, 1, 1], [], []>} : vector<16x16xf32>, vector<16x8xf32>, vector<16x8xf32> -> vector<16x8xf32>
    %277 = tpu.concatenate %222, %240, %258, %276 in 1 : vector<16x8xf32>, vector<16x8xf32>, vector<16x8xf32>, vector<16x8xf32> -> vector<16x32xf32>
    %cst_79 = arith.constant dense<0.000000e+00> : vector<16x32xf32>
    %278 = tpu.matmul %277, %195, %cst_79 {dimension_numbers = #tpu.dot_dimension_numbers<[1], [0], [0], [1], [0, 0, 1, 1], [], []>} : vector<16x32xf32>, vector<32x32xf32>, vector<16x32xf32> -> vector<16x32xf32>
    %279 = vector.extract_strided_slice %193 {offsets = [1, 0], sizes = [1, 32], strides = [1, 1]} : vector<4x96xf32> to vector<1x32xf32>
    %280 = vector.broadcast %279 : vector<1x32xf32> to vector<16x32xf32>
    %281 = arith.addf %278, %280 : vector<16x32xf32>
    %282 = arith.addf %189, %281 : vector<16x32xf32>
    %283 = vector.extract_strided_slice %193 {offsets = [1, 32], sizes = [1, 32], strides = [1, 1]} : vector<4x96xf32> to vector<1x32xf32>
    %284 = vector.extract_strided_slice %193 {offsets = [1, 64], sizes = [1, 32], strides = [1, 1]} : vector<4x96xf32> to vector<1x32xf32>
    %cst_80 = arith.constant dense<0.000000e+00> : vector<16xf32>
    %285 = vector.multi_reduction <add>, %282, %cst_80 [1] : vector<16x32xf32> to vector<16xf32>
    %286 = vector.shape_cast %285 : vector<16xf32> to vector<16x1xf32>
    %cst_81 = arith.constant 3.200000e+01 : f32
    %287 = vector.broadcast %cst_81 : f32 to vector<16x1xf32>
    %288 = arith.divf %286, %287 : vector<16x1xf32>
    %289 = vector.broadcast %288 : vector<16x1xf32> to vector<16x32xf32>
    %290 = arith.subf %282, %289 : vector<16x32xf32>
    %291 = arith.mulf %290, %290 : vector<16x32xf32>
    %cst_82 = arith.constant dense<0.000000e+00> : vector<16xf32>
    %292 = vector.multi_reduction <add>, %291, %cst_82 [1] : vector<16x32xf32> to vector<16xf32>
    %293 = vector.shape_cast %292 : vector<16xf32> to vector<16x1xf32>
    %cst_83 = arith.constant 3.200000e+01 : f32
    %294 = vector.broadcast %cst_83 : f32 to vector<16x1xf32>
    %295 = arith.divf %293, %294 : vector<16x1xf32>
    %296 = vector.broadcast %288 : vector<16x1xf32> to vector<16x32xf32>
    %297 = arith.subf %282, %296 : vector<16x32xf32>
    %cst_84 = arith.constant 9.99999996E-13 : f32
    %298 = vector.broadcast %cst_84 : f32 to vector<16x1xf32>
    %299 = arith.addf %295, %298 : vector<16x1xf32>
    %300 = math.rsqrt %299 : vector<16x1xf32>
    %301 = vector.broadcast %300 : vector<16x1xf32> to vector<16x32xf32>
    %302 = arith.mulf %297, %301 : vector<16x32xf32>
    %303 = vector.broadcast %283 : vector<1x32xf32> to vector<16x32xf32>
    %304 = arith.mulf %302, %303 : vector<16x32xf32>
    %305 = vector.broadcast %284 : vector<1x32xf32> to vector<16x32xf32>
    %306 = arith.addf %304, %305 : vector<16x32xf32>
    %cst_85 = arith.constant dense<0.000000e+00> : vector<16x64xf32>
    %307 = tpu.matmul %306, %196, %cst_85 {dimension_numbers = #tpu.dot_dimension_numbers<[1], [0], [0], [1], [0, 0, 1, 1], [], []>} : vector<16x32xf32>, vector<32x64xf32>, vector<16x64xf32> -> vector<16x64xf32>
    %308 = vector.extract_strided_slice %193 {offsets = [2, 0], sizes = [1, 64], strides = [1, 1]} : vector<4x96xf32> to vector<1x64xf32>
    %309 = vector.broadcast %308 : vector<1x64xf32> to vector<16x64xf32>
    %310 = arith.addf %307, %309 : vector<16x64xf32>
    %cst_86 = arith.constant 5.000000e-01 : f32
    %311 = vector.broadcast %cst_86 : f32 to vector<16x64xf32>
    %312 = arith.mulf %311, %310 : vector<16x64xf32>
    %cst_87 = arith.constant 4.471500e-02 : f32
    %313 = vector.broadcast %cst_87 : f32 to vector<16x64xf32>
    %314 = arith.mulf %313, %310 : vector<16x64xf32>
    %315 = arith.mulf %314, %310 : vector<16x64xf32>
    %316 = arith.mulf %315, %310 : vector<16x64xf32>
    %317 = arith.addf %310, %316 : vector<16x64xf32>
    %cst_88 = arith.constant 0.797884583 : f32
    %318 = vector.broadcast %cst_88 : f32 to vector<16x64xf32>
    %319 = arith.mulf %318, %317 : vector<16x64xf32>
    %320 = math.tanh %319 : vector<16x64xf32>
    %cst_89 = arith.constant 1.000000e+00 : f32
    %321 = vector.broadcast %cst_89 : f32 to vector<16x64xf32>
    %322 = arith.addf %321, %320 : vector<16x64xf32>
    %323 = arith.mulf %312, %322 : vector<16x64xf32>
    %cst_90 = arith.constant dense<0.000000e+00> : vector<16x32xf32>
    %324 = tpu.matmul %323, %197, %cst_90 {dimension_numbers = #tpu.dot_dimension_numbers<[1], [1], [0], [0], [0, 0, 1, 0], [], []>} : vector<16x64xf32>, vector<32x64xf32>, vector<16x32xf32> -> vector<16x32xf32>
    %325 = vector.extract_strided_slice %193 {offsets = [2, 64], sizes = [1, 32], strides = [1, 1]} : vector<4x96xf32> to vector<1x32xf32>
    %326 = vector.broadcast %325 : vector<1x32xf32> to vector<16x32xf32>
    %327 = arith.addf %324, %326 : vector<16x32xf32>
    %328 = arith.addf %306, %327 : vector<16x32xf32>
    %329 = vector.extract_strided_slice %193 {offsets = [3, 0], sizes = [1, 32], strides = [1, 1]} : vector<4x96xf32> to vector<1x32xf32>
    %330 = vector.extract_strided_slice %193 {offsets = [3, 32], sizes = [1, 32], strides = [1, 1]} : vector<4x96xf32> to vector<1x32xf32>
    %cst_91 = arith.constant dense<0.000000e+00> : vector<16xf32>
    %331 = vector.multi_reduction <add>, %328, %cst_91 [1] : vector<16x32xf32> to vector<16xf32>
    %332 = vector.shape_cast %331 : vector<16xf32> to vector<16x1xf32>
    %cst_92 = arith.constant 3.200000e+01 : f32
    %333 = vector.broadcast %cst_92 : f32 to vector<16x1xf32>
    %334 = arith.divf %332, %333 : vector<16x1xf32>
    %335 = vector.broadcast %334 : vector<16x1xf32> to vector<16x32xf32>
    %336 = arith.subf %328, %335 : vector<16x32xf32>
    %337 = arith.mulf %336, %336 : vector<16x32xf32>
    %cst_93 = arith.constant dense<0.000000e+00> : vector<16xf32>
    %338 = vector.multi_reduction <add>, %337, %cst_93 [1] : vector<16x32xf32> to vector<16xf32>
    %339 = vector.shape_cast %338 : vector<16xf32> to vector<16x1xf32>
    %cst_94 = arith.constant 3.200000e+01 : f32
    %340 = vector.broadcast %cst_94 : f32 to vector<16x1xf32>
    %341 = arith.divf %339, %340 : vector<16x1xf32>
    %342 = vector.broadcast %334 : vector<16x1xf32> to vector<16x32xf32>
    %343 = arith.subf %328, %342 : vector<16x32xf32>
    %cst_95 = arith.constant 9.99999996E-13 : f32
    %344 = vector.broadcast %cst_95 : f32 to vector<16x1xf32>
    %345 = arith.addf %341, %344 : vector<16x1xf32>
    %346 = math.rsqrt %345 : vector<16x1xf32>
    %347 = vector.broadcast %346 : vector<16x1xf32> to vector<16x32xf32>
    %348 = arith.mulf %343, %347 : vector<16x32xf32>
    %349 = vector.broadcast %329 : vector<1x32xf32> to vector<16x32xf32>
    %350 = arith.mulf %348, %349 : vector<16x32xf32>
    %351 = vector.broadcast %330 : vector<1x32xf32> to vector<16x32xf32>
    %352 = arith.addf %350, %351 : vector<16x32xf32>
    %c0_96 = arith.constant 0 : index
    %c0_97 = arith.constant 0 : index
    %353 = vector.load %arg6[%c0_96, %c0_97] : memref<32x32xf32, #tpu.memory_space<vmem>>, vector<32x32xf32>
    %c0_98 = arith.constant 0 : index
    %c0_99 = arith.constant 0 : index
    %354 = vector.load %arg7[%c0_98, %c0_99] : memref<3x32xf32, #tpu.memory_space<vmem>>, vector<3x32xf32>
    %355 = vector.extract_strided_slice %352 {offsets = [0, 0], sizes = [1, 32], strides = [1, 1]} : vector<16x32xf32> to vector<1x32xf32>
    %356 = vector.extract_strided_slice %352 {offsets = [8, 0], sizes = [1, 32], strides = [1, 1]} : vector<16x32xf32> to vector<1x32xf32>
    %357 = tpu.concatenate %355, %356 in 0 : vector<1x32xf32>, vector<1x32xf32> -> vector<2x32xf32>
    %cst_100 = arith.constant dense<0.000000e+00> : vector<2x32xf32>
    %358 = tpu.matmul %357, %353, %cst_100 {dimension_numbers = #tpu.dot_dimension_numbers<[1], [0], [0], [1], [0, 0, 1, 1], [], []>} : vector<2x32xf32>, vector<32x32xf32>, vector<2x32xf32> -> vector<2x32xf32>
    %359 = vector.extract_strided_slice %354 {offsets = [0, 0], sizes = [1, 32], strides = [1, 1]} : vector<3x32xf32> to vector<1x32xf32>
    %360 = vector.broadcast %359 : vector<1x32xf32> to vector<2x32xf32>
    %361 = arith.addf %358, %360 : vector<2x32xf32>
    %362 = math.tanh %361 : vector<2x32xf32>
    %363 = vector.extract_strided_slice %354 {offsets = [1, 0], sizes = [1, 32], strides = [1, 1]} : vector<3x32xf32> to vector<1x32xf32>
    %364 = vector.broadcast %363 : vector<1x32xf32> to vector<2x32xf32>
    %365 = arith.mulf %362, %364 : vector<2x32xf32>
    %cst_101 = arith.constant dense<0.000000e+00> : vector<2xf32>
    %366 = vector.multi_reduction <add>, %365, %cst_101 [1] : vector<2x32xf32> to vector<2xf32>
    %367 = vector.shape_cast %366 : vector<2xf32> to vector<2x1xf32>
    %368 = vector.extract_strided_slice %354 {offsets = [2, 0], sizes = [1, 1], strides = [1, 1]} : vector<3x32xf32> to vector<1x1xf32>
    %369 = vector.broadcast %368 : vector<1x1xf32> to vector<2x1xf32>
    %370 = arith.addf %367, %369 : vector<2x1xf32>
    %c0_102 = arith.constant 0 : index
    %c0_103 = arith.constant 0 : index
    %371 = vector.load %arg8[%c0_102, %c0_103] : memref<2x1xf32, #tpu.memory_space<vmem>>, vector<2x1xf32>
    tpu.vector_store %arg8[%c0_102, %c0_103], %370 {strides = array<i32>} : memref<2x1xf32, #tpu.memory_space<vmem>>, vector<2x1xf32>,
    return
  }
  func.func @transform_0(%arg0: i32) -> (i32, i32) {
    %c0_i32 = arith.constant 0 : i32
    %c0_i32_0 = arith.constant 0 : i32
    %c0_i32_1 = arith.constant 0 : i32
    return %c0_i32, %c0_i32_0 : i32, i32
  }
  func.func @transform_1(%arg0: i32) -> (i32, i32) {
    %c0_i32 = arith.constant 0 : i32
    %c0_i32_0 = arith.constant 0 : i32
    %c0_i32_1 = arith.constant 0 : i32
    return %c0_i32, %c0_i32_0 : i32, i32
  }
  func.func @transform_2(%arg0: i32) -> (i32, i32) {
    %c0_i32 = arith.constant 0 : i32
    %c0_i32_0 = arith.constant 0 : i32
    %c0_i32_1 = arith.constant 0 : i32
    return %c0_i32, %c0_i32_0 : i32, i32
  }
  func.func @transform_3(%arg0: i32) -> (i32, i32, i32) {
    %c0_i32 = arith.constant 0 : i32
    %c0_i32_0 = arith.constant 0 : i32
    %c0_i32_1 = arith.constant 0 : i32
    %c0_i32_2 = arith.constant 0 : i32
    return %c0_i32, %c0_i32_0, %c0_i32_1 : i32, i32, i32
  }
  func.func @transform_4(%arg0: i32) -> (i32, i32, i32) {
    %c0_i32 = arith.constant 0 : i32
    %c0_i32_0 = arith.constant 0 : i32
    %c0_i32_1 = arith.constant 0 : i32
    %c0_i32_2 = arith.constant 0 : i32
    return %c0_i32, %c0_i32_0, %c0_i32_1 : i32, i32, i32
  }
  func.func @transform_5(%arg0: i32) -> (i32, i32) {
    %c0_i32 = arith.constant 0 : i32
    %c0_i32_0 = arith.constant 0 : i32
    %c0_i32_1 = arith.constant 0 : i32
    return %c0_i32, %c0_i32_0 : i32, i32
  }
  func.func @transform_6(%arg0: i32) -> (i32, i32) {
    %c0_i32 = arith.constant 0 : i32
    %c0_i32_0 = arith.constant 0 : i32
    %c0_i32_1 = arith.constant 0 : i32
    return %c0_i32, %c0_i32_0 : i32, i32
  }
  func.func @transform_7(%arg0: i32) -> (i32, i32) {
    %c0_i32 = arith.constant 0 : i32
    %c0_i32_0 = arith.constant 0 : i32
    %c0_i32_1 = arith.constant 0 : i32
    return %c0_i32, %c0_i32_0 : i32, i32
  }
}

</mosaic_0001>

<bundles_post_ra>
// kernel: mul.8
= control target key start
LH: loop header
LB: loop body
LE: loop exit
PB: predicated region body
PF: predicated region fallthrough
CT: control target
= control target key end

     0   :  { %vm8_vm0 = vcmask 64512   ;;  %vm14_vm1 = vcmask 130112   ;;  %s42_s0 = inlined_call_operand.vmem [shape: f32[2,8], index: 0, kind: input, shape index: {}]   ;;  %s43_s1 = inlined_call_operand.vmem [shape: f32[16], index: 1, kind: output, shape index: {}]  }
   0x1   :  { %v5_v0 = vld [vmem:[%s42_s0] sm:$0x3]  ;;  %s25_s0 = smov 8  }
   0x2   :  { %6 = vst [vmem:[#allocation1] sm:$0x3] %v5_v0 }
   0x9   :  { %v11_v1 = vld [vmem:[#allocation1 + $0x1] sm:$0x1]   ;;  %v7_v2 = vld [vmem:[#allocation1] sm:$0x1]  }
   0xa   :  { %12 = vrot.lane.b32.xlu0 %v11_v1, %s25_s0  ;;  %9 = vst.msk [vmem:[#allocation0] sm:$0x1] %vm8_vm0, %v7_v2  }
  0x7c   :  { %v13_v3 = vpop.permute.xlu0 %12  }
  0x7d   :  { %15 = vst.msk [vmem:[#allocation0] sm:$0x1] %vm14_vm1, %v13_v3  }
  0x84   :  { %v20_v4 = vld [vmem:[#allocation0] sm:$0x1] }
  0x85   :  { %23 = vst [vmem:[%s43_s1] sm:$0x1] %v20_v4 }

// kernel: nlp_model_forward.1
= control target key start
LH: loop header
LB: loop body
LE: loop exit
PB: predicated region body
PF: predicated region fallthrough
CT: control target
= control target key end

     0   :  { %vm29_vm0 = vcmask 261120   ;;  %v57_v23 = vlaneseq  ;;  %vm171_vm1 = vcmask 64512   ;;  %s3360_s15 = smov 96   ;;  %vm259_vm2 = vcmask 130048   ;;  %s3361_s20 = smov 64   ;;  %s3942_s0 = inlined_call_operand.vmem [shape: f32[16,32], index: 0, kind: input, shape index: {}]   ;;  %s3943_s3 = inlined_call_operand.vmem [shape: f32[2,32,256], index: 3, kind: input, shape index: {}]   ;;  %s3944_s2 = inlined_call_operand.vmem [shape: f32[2,32], index: 2, kind: input, shape index: {}]   ;;  %s3945_s4 = inlined_call_operand.vmem [shape: f32[2,4,96], index: 4, kind: input, shape index: {}]   ;;  %s3946_s1 = inlined_call_operand.vmem [shape: f32[16,16], index: 1, kind: input, shape index: {}]   ;;  %s3947_s5 = inlined_call_operand.vmem [shape: f32[32,32], index: 5, kind: input, shape index: {}]   ;;  %s3948_s6 = inlined_call_operand.vmem [shape: f32[3,32], index: 6, kind: input, shape index: {}]   ;;  %s3949_s7 = inlined_call_operand.vmem [shape: f32[2,1], index: 7, kind: output, shape index: {}]  }
   0x1   :  { %v27_v0 = vld [vmem:[%s3942_s0] sm:$0xff]  ;;  %v28_v1 = vld [vmem:[%s3942_s0 + $0x8] sm:$0xff]  ;;  %v3430_v14 = vld [vmem:[%s3943_s3 + $0x30] sm:$0xff]  ;;  %s3362_s21 = smov 88   ;;  %s3363_s22 = smov 120   ;;  %vm1009_vm3 = vcmask 195584  }
   0x2   :  { %v30_v2 = vsel %vm29_vm0, %v27_v0, 0.0  ;;  %v33_v3 = vsel %vm29_vm0, %v28_v1, 0.0  ;;  %v3435_v15 = vld [vmem:[%s3943_s3 + $0x20] sm:$0xff]  ;;  %3036 = vmatprep.subr.mxu0 %v3430_v14  ;;  %v3442_v16 = vld [vmem:[%s3943_s3 + $0x10] sm:$0xff]  ;;  %v3455_v25 = vshrl.u32 %v57_v23, 7  ;;  %v3502_v48 = vld [vmem:[%s3946_s1 + $0x8] sm:$0xff] }
   0x3   :  { %31 = vadd.xlane.f32.xlu0 %v30_v2  ;;  %3037 = vmatpush3.msra.mxu0 %v3430_v14  ;;  %v3451_v17 = vld [vmem:[%s3943_s3] sm:$0xff]  ;;  %s3364_s23 = smov 56   ;;  %s3365_s24 = smov 80   ;;  %vm1271_vm4 = vcmask 523264   ;;  %vm3376_vm5 = vmmov 0   ;;  %vm2737_vm6 = vcmask 1040384  }
   0x4   :  { %3038 = vmatprep.subr.mxu0 %v3435_v15  ;;  %v3458_v26 = vsub.s32 0, %v3455_v25  ;;  %v26_v27 = vld [vmem:[%s3944_s2] sm:$0x3]  ;;  %v3464_v28 = vsub.s32 1, %v3455_v25  ;;  %s3366_s25 = smov 112   ;;  %s3367_s26 = smov 48  }
   0x5   :  { %3039 = vmatpush3.msra.mxu0 %v3435_v15  ;;  %v3479_v39 = vld [vmem:[%s3945_s4] sm:$0xf]  ;;  %s3368_s27 = smov 72   ;;  %s3369_s0 = smov 104   ;;  %vm2822_vm7 = vcmask 254976   ;;  %vm2831_vm8 = vcmask 1024  }
   0x6   :  { %3040 = vmatprep.subr.mxu0 %v3442_v16  ;;  %v60_v29 = vrot.slane %v26_v27, %v3458_v26  ;;  %v66_v32 = vrot.slane %v26_v27, %v3464_v28  ;;  %v83_v40 = vrot.slane %v3479_v39, %v3458_v26  ;;  %v3507_v51 = vld [vmem:[%s3946_s1] sm:$0xff]  ;;  %s3370_s28 = smov 40   ;;  %s3371_s29 = smov 32  }
   0x7   :  { %34 = vadd.xlane.f32.xlu0 %v33_v3  ;;  %3041 = vmatpush3.msra.mxu0 %v3442_v16  ;;  %s3372_s30 = smov 16   ;;  %s3373_s8 = smov 8  }
   0x8   :  { %3042 = vmatprep.subr.mxu0 %v3451_v17  ;;  %s3374_s9 = smov 24  }
   0x9   :  { %3043 = vmatpush3.msra.mxu0 %v3451_v17 }
  0x8c   :  { %v32_v4 = vpop.xlane.xlu0 %31 }
  0x8d   :  { %v37_v5 = vmul.f32 0.03125, %v32_v4 }
  0x8f   :  { %v39_v6 = vsub.f32 %v27_v0, %v37_v5 }
  0x90   :  { %v35_v7 = vpop.xlane.xlu0 %34 }
  0x91   :  { %v38_v8 = vmul.f32 0.03125, %v35_v7  ;;  %v41_v9 = vmul.f32 %v39_v6, %v39_v6 }
  0x93   :  { %v40_v10 = vsub.f32 %v28_v1, %v38_v8  ;;  %v43_v11 = vsel %vm29_vm0, %v41_v9, 0.0 }
  0x94   :  { %44 = vadd.xlane.f32.xlu1 %v43_v11 }
  0x95   :  { %v42_v12 = vmul.f32 %v40_v10, %v40_v10 }
  0x97   :  { %v46_v13 = vsel %vm29_vm0, %v42_v12, 0.0 }
  0x98   :  { %47 = vadd.xlane.f32.xlu1 %v46_v13 }
 0x11d   :  { %v45_v18 = vpop.xlane.xlu1 %44 }
 0x11e   :  { %v49_v19 = vmul.f32 0.03125, %v45_v18 }
 0x120   :  { %v51_v20 = vadd.f32 1e-12, %v49_v19 }
 0x121   :  { %v48_v21 = vpop.xlane.xlu1 %47 }
 0x122   :  { %3264 = vrsqrt.f32 %v51_v20  ;;  %v50_v22 = vmul.f32 0.03125, %v48_v21 }
 0x124   :  { %v52_v24 = vadd.f32 1e-12, %v50_v22 }
 0x126   :  { %3266 = vrsqrt.f32 %v52_v24 }
 0x12f   :  { %v3265_v30 = vpop.eup %3264 }
 0x130   :  { %v55_v31 = vmul.f32 %v3265_v30, %v39_v6 }
 0x132   :  { %v61_v33 = vmul.f32 %v60_v29, %v55_v31 }
 0x133   :  { %v3267_v34 = vpop.eup %3266 }
 0x134   :  { %v56_v35 = vmul.f32 %v3267_v34, %v40_v10  ;;  %v3468_v36 = vadd.f32 %v66_v32, %v61_v33 }
 0x136   :  { %v62_v37 = vmul.f32 %v60_v29, %v56_v35  ;;  %3044 = vmatprep.mubr.msk.f32.mxu0 %vm29_vm0, %v3468_v36 }
 0x138   :  { %v3472_v38 = vadd.f32 %v66_v32, %v62_v37 }
 0x13a   :  { %3045 = vmatmul.mubr.msk.f32.vlgmr.msra.gmra.mxu0 %vm29_vm0, %v3472_v38 }
 0x1fa   :  { %v3046_v41 = vpop.f32.mrf.mxu0 }
 0x1fb   :  { %v3483_v42 = vadd.f32 %v3046_v41, %v83_v40 }
 0x1fc   :  { %v156_v43 = vpop.f32.mrf.mxu0 }
 0x1fd   :  { %v3485_v44 = vadd.f32 %v156_v43, %v83_v40  ;;  %169 = vrot.lane.b32.xlu0 %v3483_v42, %s3360_s15 }
 0x1ff   :  { %167 = vrot.lane.b32.xlu1 %v3485_v44, %s3360_s15  ;;  %3051 = vmatprep.mubr.msk.f32.mxu1 %vm171_vm1, %v3485_v44 }
 0x26f   :  { %v170_v45 = vpop.permute.xlu0 %169 }
 0x270   :  { %3047 = vmatprep.subr.msk.mxu1 %vm171_vm1, %v170_v45 }
 0x271   :  { %3048 = vmatpush3.xpose.msk.msra.mxu1 %vm171_vm1, %v170_v45  ;;  %v168_v46 = vpop.permute.xlu1 %167 }
 0x272   :  { %3049 = vmatprep.subr.msk.mxu1 %vm171_vm1, %v168_v46 }
 0x275   :  { %3050 = vmatpush3.xpose.msk.msra.mxu1 %vm171_vm1, %v168_v46 }
 0x278   :  { %3052 = vmatmul.mubr.msk.f32.vlgmr.msra.gmra.mxu1 %vm171_vm1, %v3483_v42 }
 0x338   :  { %v3053_v47 = vpop.f32.mrf.mxu1 }
 0x339   :  { %v256_v49 = vmul.f32 0.35355338, %v3053_v47 }
 0x33a   :  { %v246_v50 = vpop.f32.mrf.mxu1 }
 0x33b   :  { %v255_v52 = vmul.f32 0.35355338, %v246_v50  ;;  %v258_v53 = vadd.f32 %v256_v49, %v3502_v48 }
 0x33d   :  { %v263_v54 = vsel %vm259_vm2, %v258_v53, -inf  ;;  %v257_v55 = vadd.f32 %v255_v52, %v3507_v51 }
 0x33e   :  { %264 = vmax.xlane.f32.xlu0 %v263_v54 }
 0x33f   :  { %v260_v56 = vsel %vm259_vm2, %v257_v55, -inf }
 0x340   :  { %261 = vmax.xlane.f32.xlu1 %v260_v56 }
 0x3c7   :  { %v265_v57 = vpop.xlane.xlu0 %264 }
 0x3c8   :  { %v267_v58 = vsub.f32 %v258_v53, %v265_v57 }
 0x3c9   :  { %v262_v59 = vpop.xlane.xlu1 %261 }
 0x3ca   :  { %v270_v60 = vmul.f32 1.442695, %v267_v58  ;;  %v266_v61 = vsub.f32 %v257_v55, %v262_v59 }
 0x3cc   :  { %3268 = vpow2.f32 %v270_v60  ;;  %v268_v62 = vmul.f32 1.442695, %v266_v61 }
 0x3ce   :  { %3270 = vpow2.f32 %v268_v62 }
 0x3d9   :  { %v3269_v63 = vpop.eup %3268 }
 0x3da   :  { %v275_v0 = vsel %vm259_vm2, %v3269_v63, 0.0 }
 0x3db   :  { %v3271_v1 = vpop.eup %3270  ;;  %276 = vadd.xlane.f32.xlu1 %v275_v0 }
 0x3dc   :  { %v272_v2 = vsel %vm259_vm2, %v3271_v1, 0.0 }
 0x3dd   :  { %273 = vadd.xlane.f32.xlu0 %v272_v2 }
 0x3ec   :  { %282 = vrot.lane.b32.xlu1 %v3485_v44, %s3361_s20 }
 0x3f0   :  { %375 = vrot.lane.b32.xlu1 %v3483_v42, %s3362_s21 }
 0x3f3   :  { %284 = vrot.lane.b32.xlu0 %v3483_v42, %s3361_s20 }
 0x3f4   :  { %373 = vrot.lane.b32.xlu1 %v3485_v44, %s3362_s21 }
 0x3f7   :  { %369 = vrot.lane.b32.xlu0 %v3485_v44, %s3363_s22 }
 0x3f8   :  { %371 = vrot.lane.b32.xlu1 %v3483_v42, %s3363_s22 }
 0x464   :  { %v277_v3 = vpop.xlane.xlu1 %276 }
 0x465   :  { %3272 = vrcp.f32 %v277_v3 }
 0x466   :  { %v274_v4 = vpop.xlane.xlu0 %273 }
 0x467   :  { %3274 = vrcp.f32 %v274_v4 }
 0x468   :  { %v283_v5 = vpop.permute.xlu1 %282 }
 0x46a   :  { %v285_v6 = vpop.permute.xlu0 %284 }
 0x46b   :  { %3054 = vmatprep.subr.mxu1 %v285_v6 }
 0x46c   :  { %3055 = vmatpush3.msra.mxu1 %v285_v6  ;;  %v376_v7 = vpop.permute.xlu1 %375 }
 0x46d   :  { %3056 = vmatprep.subr.mxu1 %v283_v5 }
 0x46e   :  { %3057 = vmatpush3.msra.mxu1 %v283_v5  ;;  %v370_v12 = vpop.permute.xlu0 %369 }
 0x46f   :  { %3061 = vmatprep.subr.msk.mxu1 %vm171_vm1, %v376_v7 }
 0x470   :  { %v374_v13 = vpop.permute.xlu1 %373 }
 0x472   :  { %v3273_v8 = vpop.eup %3272 }
 0x473   :  { %v281_v11 = vmul.f32 %v3273_v8, %v3269_v63 }
 0x474   :  { %v3275_v9 = vpop.eup %3274  ;;  %v372_v18 = vpop.permute.xlu1 %371 }
 0x475   :  { %v280_v10 = vmul.f32 %v3275_v9, %v3271_v1 }
 0x477   :  { %3058 = vmatprep.mubr.msk.f32.mxu1 %vm259_vm2, %v280_v10 }
 0x478   :  { %3059 = vmatmul.mubr.msk.f32.vlgmr.msra.gmra.mxu1 %vm259_vm2, %v281_v11 }
 0x479   :  { %3062 = vmatpush3.xpose.msk.msra.mxu1 %vm171_vm1, %v376_v7  ;;  %3065 = vmatprep.mubr.msk.f32.mxu1 %vm171_vm1, %v370_v12 }
 0x47a   :  { %3063 = vmatprep.subr.msk.mxu1 %vm171_vm1, %v374_v13 }
 0x47d   :  { %3064 = vmatpush3.xpose.msk.msra.mxu1 %vm171_vm1, %v374_v13 }
 0x480   :  { %3066 = vmatmul.mubr.msk.f32.vlgmr.msra.gmra.mxu1 %vm171_vm1, %v372_v18 }
 0x538   :  { %v3535_v19 = vpop.f32.mrf.mxu1 }
 0x53a   :  { %v3537_v20 = vpop.f32.mrf.mxu1 }
 0x540   :  { %v3067_v21 = vpop.f32.mrf.mxu1 }
 0x541   :  { %v461_v22 = vmul.f32 0.35355338, %v3067_v21 }
 0x542   :  { %v451_v23 = vpop.f32.mrf.mxu1 }
 0x543   :  { %v460_v24 = vmul.f32 0.35355338, %v451_v23  ;;  %v463_v27 = vadd.f32 %v461_v22, %v3502_v48 }
 0x545   :  { %v467_v29 = vsel %vm259_vm2, %v463_v27, -inf  ;;  %v462_v30 = vadd.f32 %v460_v24, %v3507_v51 }
 0x546   :  { %468 = vmax.xlane.f32.xlu1 %v467_v29 }
 0x547   :  { %v464_v31 = vsel %vm259_vm2, %v462_v30, -inf }
 0x548   :  { %465 = vmax.xlane.f32.xlu0 %v464_v31 }
 0x557   :  { %486 = vrot.lane.b32.xlu1 %v3485_v44, %s3364_s23 }
 0x55b   :  { %579 = vrot.lane.b32.xlu1 %v3483_v42, %s3365_s24 }
 0x55f   :  { %577 = vrot.lane.b32.xlu1 %v3485_v44, %s3365_s24 }
 0x563   :  { %575 = vrot.lane.b32.xlu1 %v3483_v42, %s3366_s25 }
 0x5cf   :  { %v469_v32 = vpop.xlane.xlu1 %468 }
 0x5d0   :  { %v471_v33 = vsub.f32 %v463_v27, %v469_v32 }
 0x5d1   :  { %v466_v34 = vpop.xlane.xlu0 %465 }
 0x5d2   :  { %v474_v35 = vmul.f32 1.442695, %v471_v33  ;;  %v470_v37 = vsub.f32 %v462_v30, %v466_v34 }
 0x5d3   :  { %v487_v50 = vpop.permute.xlu1 %486 }
 0x5d4   :  { %3276 = vpow2.f32 %v474_v35  ;;  %v472_v40 = vmul.f32 1.442695, %v470_v37 }
 0x5d6   :  { %3278 = vpow2.f32 %v472_v40 }
 0x5d7   :  { %v580_v53 = vpop.permute.xlu1 %579 }
 0x5db   :  { %v578_v59 = vpop.permute.xlu1 %577 }
 0x5df   :  { %v576_v60 = vpop.permute.xlu1 %575 }
 0x5e1   :  { %v3277_v41 = vpop.eup %3276 }
 0x5e2   :  { %v479_v43 = vsel %vm259_vm2, %v3277_v41, 0.0 }
 0x5e3   :  { %v3279_v45 = vpop.eup %3278  ;;  %480 = vadd.xlane.f32.xlu0 %v479_v43 }
 0x5e4   :  { %v476_v46 = vsel %vm259_vm2, %v3279_v45, 0.0 }
 0x5e7   :  { %477 = vadd.xlane.f32.xlu0 %v476_v46 }
 0x5fd   :  { %488 = vrot.lane.b32.xlu0 %v3483_v42, %s3364_s23 }
 0x601   :  { %573 = vrot.lane.b32.xlu0 %v3485_v44, %s3366_s25 }
 0x66c   :  { %v481_v47 = vpop.xlane.xlu0 %480 }
 0x66d   :  { %3280 = vrcp.f32 %v481_v47 }
 0x670   :  { %v478_v49 = vpop.xlane.xlu0 %477 }
 0x671   :  { %3282 = vrcp.f32 %v478_v49 }
 0x674   :  { %v489_v52 = vpop.permute.xlu0 %488 }
 0x675   :  { %3068 = vmatprep.subr.mxu0 %v489_v52 }
 0x676   :  { %3069 = vmatpush3.msra.mxu0 %v489_v52 }
 0x677   :  { %3070 = vmatprep.subr.mxu0 %v487_v50 }
 0x678   :  { %3071 = vmatpush3.msra.mxu0 %v487_v50  ;;  %v574_v58 = vpop.permute.xlu0 %573 }
 0x679   :  { %3075 = vmatprep.subr.msk.mxu0 %vm171_vm1, %v580_v53 }
 0x67a   :  { %v3281_v54 = vpop.eup %3280 }
 0x67b   :  { %v485_v57 = vmul.f32 %v3281_v54, %v3277_v41 }
 0x67e   :  { %v3283_v55 = vpop.eup %3282 }
 0x67f   :  { %v484_v56 = vmul.f32 %v3283_v55, %v3279_v45 }
 0x681   :  { %3072 = vmatprep.mubr.msk.f32.mxu0 %vm259_vm2, %v484_v56 }
 0x682   :  { %3073 = vmatmul.mubr.msk.f32.vlgmr.msra.gmra.mxu0 %vm259_vm2, %v485_v57 }
 0x683   :  { %3076 = vmatpush3.xpose.msk.msra.mxu0 %vm171_vm1, %v580_v53  ;;  %3079 = vmatprep.mubr.msk.f32.mxu0 %vm171_vm1, %v574_v58 }
 0x684   :  { %3077 = vmatprep.subr.msk.mxu0 %vm171_vm1, %v578_v59 }
 0x687   :  { %3078 = vmatpush3.xpose.msk.msra.mxu0 %vm171_vm1, %v578_v59 }
 0x68a   :  { %3080 = vmatmul.mubr.msk.f32.vlgmr.msra.gmra.mxu0 %vm171_vm1, %v576_v60 }
 0x742   :  { %v3565_v61 = vpop.f32.mrf.mxu0 }
 0x744   :  { %v3567_v62 = vpop.f32.mrf.mxu0 }
 0x74a   :  { %v3081_v63 = vpop.f32.mrf.mxu0 }
 0x74b   :  { %v665_v0 = vmul.f32 0.35355338, %v3081_v63 }
 0x74c   :  { %v655_v1 = vpop.f32.mrf.mxu0 }
 0x74d   :  { %v664_v2 = vmul.f32 0.35355338, %v655_v1  ;;  %v667_v3 = vadd.f32 %v665_v0, %v3502_v48 }
 0x74f   :  { %v671_v4 = vsel %vm259_vm2, %v667_v3, -inf  ;;  %v666_v5 = vadd.f32 %v664_v2, %v3507_v51 }
 0x750   :  { %672 = vmax.xlane.f32.xlu1 %v671_v4 }
 0x751   :  { %v668_v6 = vsel %vm259_vm2, %v666_v5, -inf }
 0x752   :  { %669 = vmax.xlane.f32.xlu0 %v668_v6 }
 0x761   :  { %690 = vrot.lane.b32.xlu1 %v3485_v44, %s3367_s26 }
 0x765   :  { %783 = vrot.lane.b32.xlu1 %v3483_v42, %s3368_s27 }
 0x769   :  { %781 = vrot.lane.b32.xlu1 %v3485_v44, %s3368_s27 }
 0x76d   :  { %779 = vrot.lane.b32.xlu1 %v3483_v42, %s3369_s0 }
 0x7d9   :  { %v673_v7 = vpop.xlane.xlu1 %672 }
 0x7da   :  { %v675_v8 = vsub.f32 %v667_v3, %v673_v7 }
 0x7db   :  { %v670_v9 = vpop.xlane.xlu0 %669 }
 0x7dc   :  { %v678_v10 = vmul.f32 1.442695, %v675_v8  ;;  %v674_v11 = vsub.f32 %v666_v5, %v670_v9 }
 0x7dd   :  { %v691_v27 = vpop.permute.xlu1 %690 }
 0x7de   :  { %3284 = vpow2.f32 %v678_v10  ;;  %v676_v12 = vmul.f32 1.442695, %v674_v11 }
 0x7e0   :  { %3286 = vpow2.f32 %v676_v12 }
 0x7e1   :  { %v784_v30 = vpop.permute.xlu1 %783 }
 0x7e5   :  { %v782_v37 = vpop.permute.xlu1 %781 }
 0x7e9   :  { %v780_v40 = vpop.permute.xlu1 %779 }
 0x7eb   :  { %v3285_v13 = vpop.eup %3284 }
 0x7ec   :  { %v683_v18 = vsel %vm259_vm2, %v3285_v13, 0.0 }
 0x7ed   :  { %v3287_v21 = vpop.eup %3286  ;;  %684 = vadd.xlane.f32.xlu0 %v683_v18 }
 0x7ee   :  { %v680_v22 = vsel %vm259_vm2, %v3287_v21, 0.0 }
 0x7f1   :  { %681 = vadd.xlane.f32.xlu0 %v680_v22 }
 0x807   :  { %692 = vrot.lane.b32.xlu0 %v3483_v42, %s3367_s26 }
 0x80b   :  { %777 = vrot.lane.b32.xlu0 %v3485_v44, %s3369_s0 }
 0x876   :  { %v685_v23 = vpop.xlane.xlu0 %684 }
 0x877   :  { %3288 = vrcp.f32 %v685_v23 }
 0x87a   :  { %v682_v24 = vpop.xlane.xlu0 %681 }
 0x87b   :  { %3290 = vrcp.f32 %v682_v24 }
 0x87e   :  { %v693_v29 = vpop.permute.xlu0 %692 }
 0x87f   :  { %3082 = vmatprep.subr.mxu1 %v693_v29 }
 0x880   :  { %3083 = vmatpush3.msra.mxu1 %v693_v29 }
 0x881   :  { %3084 = vmatprep.subr.mxu1 %v691_v27 }
 0x882   :  { %3085 = vmatpush3.msra.mxu1 %v691_v27  ;;  %v778_v35 = vpop.permute.xlu0 %777 }
 0x883   :  { %3089 = vmatprep.subr.msk.mxu1 %vm171_vm1, %v784_v30 }
 0x884   :  { %v3289_v31 = vpop.eup %3288 }
 0x885   :  { %v689_v34 = vmul.f32 %v3289_v31, %v3285_v13 }
 0x888   :  { %v3291_v32 = vpop.eup %3290 }
 0x889   :  { %v688_v33 = vmul.f32 %v3291_v32, %v3287_v21 }
 0x88b   :  { %3086 = vmatprep.mubr.msk.f32.mxu1 %vm259_vm2, %v688_v33 }
 0x88c   :  { %3087 = vmatmul.mubr.msk.f32.vlgmr.msra.gmra.mxu1 %vm259_vm2, %v689_v34 }
 0x88d   :  { %3090 = vmatpush3.xpose.msk.msra.mxu1 %vm171_vm1, %v784_v30  ;;  %3093 = vmatprep.mubr.msk.f32.mxu1 %vm171_vm1, %v778_v35 }
 0x88e   :  { %3091 = vmatprep.subr.msk.mxu1 %vm171_vm1, %v782_v37 }
 0x891   :  { %3092 = vmatpush3.xpose.msk.msra.mxu1 %vm171_vm1, %v782_v37 }
 0x894   :  { %3094 = vmatmul.mubr.msk.f32.vlgmr.msra.gmra.mxu1 %vm171_vm1, %v780_v40 }
 0x94c   :  { %v3088_v41 = vpop.f32.mrf.mxu1 }
 0x94e   :  { %v768_v43 = vpop.f32.mrf.mxu1 }
 0x954   :  { %v3095_v45 = vpop.f32.mrf.mxu1 }
 0x955   :  { %v869_v46 = vmul.f32 0.35355338, %v3095_v45 }
 0x956   :  { %v859_v47 = vpop.f32.mrf.mxu1 }
 0x957   :  { %v868_v49 = vmul.f32 0.35355338, %v859_v47  ;;  %v871_v50 = vadd.f32 %v869_v46, %v3502_v48 }
 0x959   :  { %v875_v52 = vsel %vm259_vm2, %v871_v50, -inf  ;;  %v870_v53 = vadd.f32 %v868_v49, %v3507_v51 }
 0x95a   :  { %876 = vmax.xlane.f32.xlu1 %v875_v52 }
 0x95b   :  { %v872_v54 = vsel %vm259_vm2, %v870_v53, -inf }
 0x95c   :  { %873 = vmax.xlane.f32.xlu0 %v872_v54  ;;  %v74_v54 = vld [vmem:[%s3943_s3 + $0x18] sm:$0xff] }
 0x96b   :  { %894 = vrot.lane.b32.xlu1 %v3485_v44, %s3370_s28 }
 0x96f   :  { %1026 = vrot.lane.b32.xlu1 %v3430_v14, %s3371_s29 }
 0x973   :  { %1024 = vrot.lane.b32.xlu1 %v3435_v15, %s3371_s29 }
 0x977   :  { %1022 = vrot.lane.b32.xlu1 %v3442_v16, %s3371_s29 }
 0x97b   :  { %991 = vrot.lane.b32.xlu1 %v768_v43, %s3372_s30 }
 0x9e3   :  { %v877_v55 = vpop.xlane.xlu1 %876 }
 0x9e4   :  { %v879_v56 = vsub.f32 %v871_v50, %v877_v55  ;;  %v72_v55 = vld [vmem:[%s3943_s3 + $0x8] sm:$0xff] }
 0x9e5   :  { %v874_v57 = vpop.xlane.xlu0 %873 }
 0x9e6   :  { %v882_v58 = vmul.f32 1.442695, %v879_v56  ;;  %v878_v59 = vsub.f32 %v870_v53, %v874_v57  ;;  %v76_v53 = vld [vmem:[%s3943_s3 + $0x28] sm:$0xff]  ;;  %v3660_v56 = vsub.s32 2, %v3455_v25 }
 0x9e7   :  { %v895_v1 = vpop.permute.xlu1 %894 }
 0x9e8   :  { %3292 = vpow2.f32 %v882_v58  ;;  %v880_v44 = vmul.f32 1.442695, %v878_v59  ;;  %v1155_v57 = vrot.slane %v3479_v39, %v3660_v56 }
 0x9ea   :  { %3294 = vpow2.f32 %v880_v44 }
 0x9f5   :  { %v3293_v60 = vpop.eup %3292 }
 0x9f6   :  { %v887_v14 = vsel %vm259_vm2, %v3293_v60, 0.0 }
 0x9f7   :  { %v3295_v63 = vpop.eup %3294  ;;  %888 = vadd.xlane.f32.xlu0 %v887_v14 }
 0x9f8   :  { %v884_v15 = vsel %vm259_vm2, %v3295_v63, 0.0 }
 0x9fb   :  { %885 = vadd.xlane.f32.xlu0 %v884_v15 }
 0xa11   :  { %896 = vrot.lane.b32.xlu0 %v3483_v42, %s3370_s28  ;;  %v1027_v42 = vpop.permute.xlu1 %1026 }
 0xa15   :  { %983 = vrot.lane.b32.xlu0 %v3567_v62, %s3373_s8 }
 0xa19   :  { %985 = vrot.lane.b32.xlu0 %v3565_v61, %s3373_s8  ;;  %v1025_v61 = vpop.permute.xlu1 %1024 }
 0xa1d   :  { %993 = vrot.lane.b32.xlu0 %v3088_v41, %s3372_s30 }
 0xa21   :  { %1020 = vrot.lane.b32.xlu0 %v3451_v17, %s3371_s29  ;;  %v1023_v17 = vpop.permute.xlu1 %1022 }
 0xa25   :  { %v992_v12 = vpop.permute.xlu1 %991 }
 0xa80   :  { %v889_v16 = vpop.xlane.xlu0 %888 }
 0xa81   :  { %3296 = vrcp.f32 %v889_v16 }
 0xa84   :  { %v886_v0 = vpop.xlane.xlu0 %885 }
 0xa85   :  { %3298 = vrcp.f32 %v886_v0 }
 0xa88   :  { %v897_v2 = vpop.permute.xlu0 %896 }
 0xa89   :  { %3096 = vmatprep.subr.mxu0 %v897_v2 }
 0xa8a   :  { %3097 = vmatpush3.msra.mxu0 %v897_v2 }
 0xa8b   :  { %3098 = vmatprep.subr.mxu0 %v895_v1 }
 0xa8c   :  { %3099 = vmatpush3.msra.mxu0 %v895_v1  ;;  %v984_v6 = vpop.permute.xlu0 %983 }
 0xa8d   :  { %3103 = vmatprep.subr.mxu0 %v1027_v42  ;;  %v1005_v13 = vsel %vm171_vm1, %v3537_v20, %v984_v6  ;;  %v1015_v20 = vrot.slane %v3479_v39, %v3464_v28 }
 0xa8e   :  { %v3297_v62 = vpop.eup %3296  ;;  %v1007_v21 = vsel %vm259_vm2, %v1005_v13, %v992_v12 }
 0xa8f   :  { %v893_v5 = vmul.f32 %v3297_v62, %v3293_v60 }
 0xa90   :  { %v986_v7 = vpop.permute.xlu0 %985 }
 0xa91   :  { %v1006_v23 = vsel %vm171_vm1, %v3535_v19, %v986_v7 }
 0xa92   :  { %v3299_v3 = vpop.eup %3298 }
 0xa93   :  { %v892_v4 = vmul.f32 %v3299_v3, %v3295_v63 }
 0xa94   :  { %v994_v8 = vpop.permute.xlu0 %993 }
 0xa95   :  { %3100 = vmatprep.mubr.msk.f32.mxu0 %vm259_vm2, %v892_v4  ;;  %v1008_v24 = vsel %vm259_vm2, %v1006_v23, %v994_v8 }
 0xa96   :  { %3101 = vmatmul.mubr.msk.f32.vlgmr.msra.gmra.mxu0 %vm259_vm2, %v893_v5 }
 0xa97   :  { %3104 = vmatpush3.msra.mxu0 %v1027_v42 }
 0xa98   :  { %3105 = vmatprep.subr.mxu0 %v1025_v61  ;;  %v1021_v9 = vpop.permute.xlu0 %1020 }
 0xa99   :  { %3106 = vmatpush3.msra.mxu0 %v1025_v61 }
 0xa9a   :  { %3107 = vmatprep.subr.mxu0 %v1023_v17 }
 0xa9b   :  { %3108 = vmatpush3.msra.mxu0 %v1023_v17 }
 0xa9c   :  { %3109 = vmatprep.subr.mxu0 %v1021_v9 }
 0xa9d   :  { %3110 = vmatpush3.msra.mxu0 %v1021_v9 }
 0xb56   :  { %v3102_v10 = vpop.f32.mrf.mxu0 }
 0xb58   :  { %v972_v11 = vpop.f32.mrf.mxu0 }
 0xb59   :  { %999 = vrot.lane.b32.xlu1 %v972_v11, %s3374_s9 }
 0xb5d   :  { %1001 = vrot.lane.b32.xlu1 %v3102_v10, %s3374_s9 }
 0xbcb   :  { %v1000_v18 = vpop.permute.xlu1 %999 }
 0xbcc   :  { %v1010_v22 = vsel %vm1009_vm3, %v1007_v21, %v1000_v18 }
 0xbcd   :  { %3111 = vmatprep.mubr.msk.f32.mxu0 %vm29_vm0, %v1010_v22 }
 0xbcf   :  { %v1002_v27 = vpop.permute.xlu1 %1001 }
 0xbd0   :  { %v1011_v29 = vsel %vm1009_vm3, %v1008_v24, %v1002_v27 }
 0xbd1   :  { %3112 = vmatmul.mubr.msk.f32.vlgmr.msra.gmra.mxu0 %vm29_vm0, %v1011_v29 }
 0xc91   :  { %v3113_v30 = vpop.f32.mrf.mxu0 }
 0xc92   :  { %v1110_v31 = vadd.f32 %v3113_v30, %v1015_v20 }
 0xc93   :  { %v1104_v32 = vpop.f32.mrf.mxu0 }
 0xc94   :  { %v1105_v33 = vadd.f32 %v1104_v32, %v1015_v20  ;;  %v1114_v34 = vadd.f32 %v1110_v31, %v3472_v38 }
 0xc96   :  { %v1118_v35 = vsel %vm29_vm0, %v1114_v34, 0.0  ;;  %v1113_v19 = vadd.f32 %v1105_v33, %v3468_v36  ;;  %v78_v36 = vld [vmem:[%s3943_s3 + $0x38] sm:$0xff] }
 0xc97   :  { %1119 = vadd.xlane.f32.xlu1 %v1118_v35  ;;  %3114 = vmatprep.subr.mxu1 %v78_v36 }
 0xc98   :  { %v1115_v37 = vsel %vm29_vm0, %v1113_v19, 0.0  ;;  %3115 = vmatpush3.msra.mxu1 %v78_v36 }
 0xc99   :  { %1116 = vadd.xlane.f32.xlu0 %v1115_v37  ;;  %3116 = vmatprep.subr.mxu1 %v76_v53 }
 0xc9a   :  { %3117 = vmatpush3.msra.mxu1 %v76_v53 }
 0xc9b   :  { %3118 = vmatprep.subr.mxu1 %v74_v54 }
 0xc9c   :  { %3119 = vmatpush3.msra.mxu1 %v74_v54 }
 0xc9d   :  { %3120 = vmatprep.subr.mxu1 %v72_v55 }
 0xc9e   :  { %3121 = vmatpush3.msra.mxu1 %v72_v55 }
 0xca8   :  { %1147 = vrot.lane.b32.xlu1 %v1015_v20, %s3361_s20 }
 0xcac   :  { %1265 = vrot.lane.b32.xlu1 %v78_v36, %s3361_s20 }
 0xcb0   :  { %1263 = vrot.lane.b32.xlu1 %v76_v53, %s3361_s20 }
 0xcb4   :  { %1259 = vrot.lane.b32.xlu1 %v72_v55, %s3361_s20 }
 0xd20   :  { %v1120_v40 = vpop.xlane.xlu1 %1119 }
 0xd21   :  { %v1122_v41 = vmul.f32 0.03125, %v1120_v40 }
 0xd22   :  { %v1117_v43 = vpop.xlane.xlu0 %1116 }
 0xd23   :  { %v1121_v45 = vmul.f32 0.03125, %v1117_v43  ;;  %v1124_v46 = vsub.f32 %v1114_v34, %v1122_v41 }
 0xd24   :  { %v1148_v1 = vpop.permute.xlu1 %1147 }
 0xd25   :  { %v1123_v47 = vsub.f32 %v1113_v19, %v1121_v45  ;;  %v1126_v38 = vmul.f32 %v1124_v46, %v1124_v46 }
 0xd27   :  { %v1125_v49 = vmul.f32 %v1123_v47, %v1123_v47  ;;  %v1130_v52 = vsel %vm29_vm0, %v1126_v38, 0.0 }
 0xd28   :  { %v1266_v5 = vpop.permute.xlu1 %1265 }
 0xd29   :  { %v1127_v50 = vsel %vm29_vm0, %v1125_v49, 0.0  ;;  %3125 = vmatprep.subr.msk.mxu0 %vm1271_vm4, %v1266_v5 }
 0xd2a   :  { %1128 = vadd.xlane.f32.xlu0 %v1127_v50  ;;  %3126 = vmatpush3.xpose.msk.msra.mxu0 %vm1271_vm4, %v1266_v5 }
 0xd2c   :  { %v1264_v17 = vpop.permute.xlu1 %1263 }
 0xd2d   :  { %3127 = vmatprep.subr.msk.mxu0 %vm1271_vm4, %v1264_v17 }
 0xd2e   :  { %1131 = vadd.xlane.f32.xlu0 %v1130_v52  ;;  %3128 = vmatpush3.xpose.msk.msra.mxu0 %vm1271_vm4, %v1264_v17  ;;  %v1391_v52 = vsub.s32 3, %v3455_v25  ;;  %v2732_v25 = vld [vmem:[%s3947_s5 + $0x18] sm:$0xff] }
 0xd30   :  { %v1260_v7 = vpop.permute.xlu1 %1259  ;;  %v1392_v36 = vrot.slane %v3479_v39, %v1391_v52  ;;  %v3689_v39 = vld [vmem:[%s3943_s3 + $0x70] sm:$0xff] }
 0xd31   :  { %3136 = vmatprep.subr.mxu1 %v3689_v39 }
 0xd44   :  { %1142 = vrot.lane.b32.xlu0 %v1015_v20, %s3360_s15 }
 0xd48   :  { %1261 = vrot.lane.b32.xlu0 %v74_v54, %s3361_s20 }
 0xd4c   :  { %1268 = vrot.lane.b32.xlu0 %v1155_v57, %s3361_s20 }
 0xdb3   :  { %v1129_v58 = vpop.xlane.xlu0 %1128 }
 0xdb4   :  { %v1133_v59 = vmul.f32 0.03125, %v1129_v58 }
 0xdb6   :  { %v1135_v44 = vadd.f32 1e-12, %v1133_v59 }
 0xdb7   :  { %v1132_v60 = vpop.xlane.xlu0 %1131 }
 0xdb8   :  { %3300 = vrsqrt.f32 %v1135_v44  ;;  %v1134_v14 = vmul.f32 0.03125, %v1132_v60 }
 0xdba   :  { %v1136_v63 = vadd.f32 1e-12, %v1134_v14 }
 0xdbb   :  { %v1143_v16 = vpop.permute.xlu0 %1142 }
 0xdbc   :  { %3302 = vrsqrt.f32 %v1136_v63 }
 0xdbf   :  { %v1262_v6 = vpop.permute.xlu0 %1261 }
 0xdc0   :  { %3129 = vmatprep.subr.msk.mxu0 %vm1271_vm4, %v1262_v6 }
 0xdc1   :  { %3130 = vmatpush3.xpose.msk.msra.mxu0 %vm1271_vm4, %v1262_v6 }
 0xdc2   :  { %3131 = vmatprep.subr.msk.mxu0 %vm1271_vm4, %v1260_v7 }
 0xdc3   :  { %v1269_v40 = vpop.permute.xlu0 %1268 }
 0xdc5   :  { %v3301_v15 = vpop.eup %3300  ;;  %3132 = vmatpush3.xpose.msk.msra.mxu0 %vm1271_vm4, %v1260_v7 }
 0xdc6   :  { %v1139_v0 = vmul.f32 %v3301_v15, %v1123_v47  ;;  %v3696_v15 = vld [vmem:[%s3943_s3 + $0x60] sm:$0xff] }
 0xdc8   :  { %v1145_v2 = vmul.f32 %v1143_v16, %v1139_v0  ;;  %v3710_v0 = vld [vmem:[%s3943_s3 + $0x40] sm:$0xff] }
 0xdc9   :  { %v3303_v42 = vpop.eup %3302 }
 0xdca   :  { %v1140_v62 = vmul.f32 %v3303_v42, %v1124_v46  ;;  %v1150_v3 = vadd.f32 %v1148_v1, %v1145_v2 }
 0xdcc   :  { %v1146_v61 = vmul.f32 %v1143_v16, %v1140_v62  ;;  %3122 = vmatprep.mubr.msk.f32.mxu1 %vm29_vm0, %v1150_v3  ;;  %v3703_v16 = vld [vmem:[%s3943_s3 + $0x50] sm:$0xff] }
 0xdce   :  { %v1151_v4 = vadd.f32 %v1148_v1, %v1146_v61 }
 0xdd0   :  { %3123 = vmatmul.mubr.msk.f32.vlgmr.msra.gmra.mxu1 %vm29_vm0, %v1151_v4 }
 0xdd1   :  { %3137 = vmatpush3.msra.mxu1 %v3689_v39 }
 0xdd2   :  { %3138 = vmatprep.subr.mxu1 %v3696_v15 }
 0xdd3   :  { %3139 = vmatpush3.msra.mxu1 %v3696_v15 }
 0xdd4   :  { %3140 = vmatprep.subr.mxu1 %v3703_v16 }
 0xdd5   :  { %3141 = vmatpush3.msra.mxu1 %v3703_v16 }
 0xdd6   :  { %3142 = vmatprep.subr.mxu1 %v3710_v0 }
 0xdd7   :  { %3143 = vmatpush3.msra.mxu1 %v3710_v0 }
 0xe90   :  { %v3124_v8 = vpop.f32.mrf.mxu1 }
 0xe91   :  { %v1234_v9 = vadd.f32 %v3124_v8, %v1155_v57 }
 0xe92   :  { %v1228_v10 = vpop.f32.mrf.mxu1 }
 0xe93   :  { %v1240_v11 = vmul.f32 0.044715, %v1234_v9  ;;  %v1229_v12 = vadd.f32 %v1228_v10, %v1155_v57  ;;  %v1238_v35 = vmul.f32 0.5, %v1234_v9 }
 0xe95   :  { %v1242_v13 = vmul.f32 %v1240_v11, %v1234_v9  ;;  %v1239_v18 = vmul.f32 0.044715, %v1229_v12  ;;  %v1237_v33 = vmul.f32 0.5, %v1229_v12 }
 0xe97   :  { %v1244_v21 = vmul.f32 %v1242_v13, %v1234_v9  ;;  %v1241_v22 = vmul.f32 %v1239_v18, %v1229_v12 }
 0xe99   :  { %v1246_v23 = vadd.f32 %v1244_v21, %v1234_v9  ;;  %v1243_v24 = vmul.f32 %v1241_v22, %v1229_v12 }
 0xe9b   :  { %v1248_v27 = vmul.f32 0.7978846, %v1246_v23  ;;  %v1245_v29 = vadd.f32 %v1243_v24, %v1229_v12  ;;  %v3725_v12 = vld [vmem:[%s3945_s4 + $0x4] sm:$0xf] }
 0xe9c   :  { %v1415_v13 = vrot.slane %v3725_v12, %v3458_v26 }
 0xe9d   :  { %3304 = vtanh.f32 %v1248_v27  ;;  %v1247_v20 = vmul.f32 0.7978846, %v1245_v29 }
 0xe9f   :  { %3306 = vtanh.f32 %v1247_v20 }
 0xeaa   :  { %v3305_v30 = vpop.eup %3304 }
 0xeab   :  { %v1252_v32 = vadd.f32 1.0, %v3305_v30 }
 0xeac   :  { %v3307_v31 = vpop.eup %3306 }
 0xead   :  { %v1251_v34 = vadd.f32 1.0, %v3307_v31  ;;  %v1254_v37 = vmul.f32 %v1252_v32, %v1238_v35 }
 0xeaf   :  { %v1253_v19 = vmul.f32 %v1251_v34, %v1237_v33 }
 0xeb1   :  { %3133 = vmatprep.mubr.msk.f32.mxu0 %vm1271_vm4, %v1253_v19 }
 0xeb2   :  { %3134 = vmatmul.mubr.msk.f32.vlgmr.msra.gmra.mxu0 %vm1271_vm4, %v1254_v37 }
 0xf72   :  { %v3135_v41 = vpop.f32.mrf.mxu0 }
 0xf73   :  { %v1358_v43 = vadd.f32 %v3135_v41, %v1269_v40 }
 0xf74   :  { %v1352_v45 = vpop.f32.mrf.mxu0 }
 0xf75   :  { %v1353_v46 = vadd.f32 %v1352_v45, %v1269_v40  ;;  %v1362_v47 = vadd.f32 %v1358_v43, %v1151_v4 }
 0xf77   :  { %v1366_v49 = vsel %vm29_vm0, %v1362_v47, 0.0  ;;  %v1361_v50 = vadd.f32 %v1353_v46, %v1150_v3 }
 0xf78   :  { %1367 = vadd.xlane.f32.xlu0 %v1366_v49 }
 0xf79   :  { %v1363_v38 = vsel %vm29_vm0, %v1361_v50, 0.0 }
 0xf7a   :  { %1364 = vadd.xlane.f32.xlu1 %v1363_v38 }
 0xf8b   :  { %1396 = vrot.lane.b32.xlu1 %v1392_v36, %s3360_s15 }
0x1001   :  { %v1368_v53 = vpop.xlane.xlu0 %1367 }
0x1002   :  { %v1370_v54 = vmul.f32 0.03125, %v1368_v53 }
0x1003   :  { %v1365_v55 = vpop.xlane.xlu1 %1364 }
0x1004   :  { %v1369_v57 = vmul.f32 0.03125, %v1365_v55  ;;  %v1372_v58 = vsub.f32 %v1362_v47, %v1370_v54 }
0x1006   :  { %v1371_v59 = vsub.f32 %v1361_v50, %v1369_v57  ;;  %v1374_v14 = vmul.f32 %v1372_v58, %v1372_v58 }
0x1007   :  { %v1397_v17 = vpop.permute.xlu1 %1396 }
0x1008   :  { %v1373_v44 = vmul.f32 %v1371_v59, %v1371_v59  ;;  %v1378_v63 = vsel %vm29_vm0, %v1374_v14, 0.0 }
0x100a   :  { %v1375_v60 = vsel %vm29_vm0, %v1373_v44, 0.0 }
0x100b   :  { %1376 = vadd.xlane.f32.xlu0 %v1375_v60 }
0x100f   :  { %1379 = vadd.xlane.f32.xlu0 %v1378_v63 }
0x1094   :  { %v1377_v1 = vpop.xlane.xlu0 %1376 }
0x1095   :  { %v1381_v2 = vmul.f32 0.03125, %v1377_v1 }
0x1097   :  { %v1383_v42 = vadd.f32 1e-12, %v1381_v2 }
0x1098   :  { %v1380_v62 = vpop.xlane.xlu0 %1379 }
0x1099   :  { %3308 = vrsqrt.f32 %v1383_v42  ;;  %v1382_v3 = vmul.f32 0.03125, %v1380_v62 }
0x109b   :  { %v1384_v61 = vadd.f32 1e-12, %v1382_v3 }
0x109d   :  { %3310 = vrsqrt.f32 %v1384_v61 }
0x10a6   :  { %v3309_v4 = vpop.eup %3308 }
0x10a7   :  { %v1387_v5 = vmul.f32 %v3309_v4, %v1371_v59 }
0x10a9   :  { %v1393_v6 = vmul.f32 %v1392_v36, %v1387_v5 }
0x10aa   :  { %v3311_v7 = vpop.eup %3310 }
0x10ab   :  { %v1388_v8 = vmul.f32 %v3311_v7, %v1372_v58  ;;  %v3714_v9 = vadd.f32 %v1397_v17, %v1393_v6 }
0x10ad   :  { %v1394_v10 = vmul.f32 %v1392_v36, %v1388_v8  ;;  %3144 = vmatprep.mubr.msk.f32.mxu1 %vm29_vm0, %v3714_v9 }
0x10af   :  { %v3718_v11 = vadd.f32 %v1397_v17, %v1394_v10 }
0x10b1   :  { %3145 = vmatmul.mubr.msk.f32.vlgmr.msra.gmra.mxu1 %vm29_vm0, %v3718_v11 }
0x1171   :  { %v3146_v18 = vpop.f32.mrf.mxu1 }
0x1172   :  { %v3729_v21 = vadd.f32 %v3146_v18, %v1415_v13 }
0x1173   :  { %v1488_v22 = vpop.f32.mrf.mxu1 }
0x1174   :  { %v3731_v23 = vadd.f32 %v1488_v22, %v1415_v13  ;;  %1501 = vrot.lane.b32.xlu0 %v3729_v21, %s3360_s15 }
0x1176   :  { %1499 = vrot.lane.b32.xlu1 %v3731_v23, %s3360_s15  ;;  %3151 = vmatprep.mubr.msk.f32.mxu1 %vm171_vm1, %v3731_v23 }
0x1178   :  { %1699 = vrot.lane.b32.xlu0 %v3731_v23, %s3363_s22 }
0x117a   :  { %1705 = vrot.lane.b32.xlu1 %v3729_v21, %s3362_s21 }
0x117e   :  { %1703 = vrot.lane.b32.xlu1 %v3731_v23, %s3362_s21 }
0x1182   :  { %1701 = vrot.lane.b32.xlu1 %v3729_v21, %s3363_s22 }
0x11e6   :  { %v1502_v24 = vpop.permute.xlu0 %1501 }
0x11e7   :  { %3147 = vmatprep.subr.msk.mxu1 %vm171_vm1, %v1502_v24 }
0x11e8   :  { %3148 = vmatpush3.xpose.msk.msra.mxu1 %vm171_vm1, %v1502_v24  ;;  %v1500_v27 = vpop.permute.xlu1 %1499 }
0x11e9   :  { %3149 = vmatprep.subr.msk.mxu1 %vm171_vm1, %v1500_v27 }
0x11ea   :  { %v1700_v20 = vpop.permute.xlu0 %1699 }
0x11ec   :  { %3150 = vmatpush3.xpose.msk.msra.mxu1 %vm171_vm1, %v1500_v27  ;;  %v1706_v29 = vpop.permute.xlu1 %1705 }
0x11ed   :  { %3161 = vmatprep.subr.msk.mxu1 %vm171_vm1, %v1706_v29 }
0x11ef   :  { %3152 = vmatmul.mubr.msk.f32.vlgmr.msra.gmra.mxu1 %vm171_vm1, %v3729_v21 }
0x11f0   :  { %v1704_v30 = vpop.permute.xlu1 %1703  ;;  %3162 = vmatpush3.xpose.msk.msra.mxu1 %vm171_vm1, %v1706_v29  ;;  %3165 = vmatprep.mubr.msk.f32.mxu1 %vm171_vm1, %v1700_v20 }
0x11f1   :  { %3163 = vmatprep.subr.msk.mxu1 %vm171_vm1, %v1704_v30 }
0x11f4   :  { %3164 = vmatpush3.xpose.msk.msra.mxu1 %vm171_vm1, %v1704_v30  ;;  %v1702_v31 = vpop.permute.xlu1 %1701 }
0x11f7   :  { %3166 = vmatmul.mubr.msk.f32.vlgmr.msra.gmra.mxu1 %vm171_vm1, %v1702_v31 }
0x12af   :  { %v3153_v32 = vpop.f32.mrf.mxu1 }
0x12b0   :  { %v1587_v33 = vmul.f32 0.35355338, %v3153_v32 }
0x12b1   :  { %v1577_v34 = vpop.f32.mrf.mxu1 }
0x12b2   :  { %v1586_v35 = vmul.f32 0.35355338, %v1577_v34  ;;  %v1589_v19 = vadd.f32 %v1587_v33, %v3502_v48 }
0x12b4   :  { %v1593_v37 = vsel %vm259_vm2, %v1589_v19, -inf  ;;  %v1588_v40 = vadd.f32 %v1586_v35, %v3507_v51 }
0x12b5   :  { %1594 = vmax.xlane.f32.xlu1 %v1593_v37 }
0x12b6   :  { %v1590_v41 = vsel %vm259_vm2, %v1588_v40, -inf }
0x12b7   :  { %v3167_v43 = vpop.f32.mrf.mxu1  ;;  %1591 = vmax.xlane.f32.xlu0 %v1590_v41 }
0x12b8   :  { %v1791_v46 = vmul.f32 0.35355338, %v3167_v43 }
0x12b9   :  { %v1781_v45 = vpop.f32.mrf.mxu1 }
0x12ba   :  { %v1790_v47 = vmul.f32 0.35355338, %v1781_v45  ;;  %v1793_v38 = vadd.f32 %v1791_v46, %v3502_v48 }
0x12bc   :  { %v1792_v49 = vadd.f32 %v1790_v47, %v3507_v51  ;;  %v1797_v36 = vsel %vm259_vm2, %v1793_v38, -inf }
0x12be   :  { %v1794_v50 = vsel %vm259_vm2, %v1792_v49, -inf }
0x12bf   :  { %1795 = vmax.xlane.f32.xlu0 %v1794_v50 }
0x12c3   :  { %1798 = vmax.xlane.f32.xlu0 %v1797_v36 }
0x12c6   :  { %1612 = vrot.lane.b32.xlu1 %v3731_v23, %s3361_s20 }
0x12ca   :  { %1818 = vrot.lane.b32.xlu1 %v3729_v21, %s3364_s23 }
0x12ce   :  { %1816 = vrot.lane.b32.xlu1 %v3731_v23, %s3364_s23 }
0x12d9   :  { %1614 = vrot.lane.b32.xlu0 %v3729_v21, %s3361_s20 }
0x133e   :  { %v1595_v51 = vpop.xlane.xlu1 %1594 }
0x133f   :  { %v1597_v53 = vsub.f32 %v1589_v19, %v1595_v51 }
0x1340   :  { %v1592_v54 = vpop.xlane.xlu0 %1591 }
0x1341   :  { %v1600_v48 = vmul.f32 1.442695, %v1597_v53  ;;  %v1596_v55 = vsub.f32 %v1588_v40, %v1592_v54  ;;  %v3359_v53 = vld [vmem:[%s3946_s1] sm:$0xff] }
0x1342   :  { %v1613_v63 = vpop.permute.xlu1 %1612 }
0x1343   :  { %3312 = vpow2.f32 %v1600_v48  ;;  %v1598_v57 = vmul.f32 1.442695, %v1596_v55 }
0x1345   :  { %3314 = vpow2.f32 %v1598_v57 }
0x1346   :  { %v1819_v4 = vpop.permute.xlu1 %1818 }
0x1348   :  { %v1796_v58 = vpop.xlane.xlu0 %1795 }
0x1349   :  { %v1800_v59 = vsub.f32 %v1792_v49, %v1796_v58 }
0x134a   :  { %v1817_v8 = vpop.permute.xlu1 %1816 }
0x134b   :  { %v1802_v44 = vmul.f32 1.442695, %v1800_v59 }
0x134c   :  { %v1799_v60 = vpop.xlane.xlu0 %1798 }
0x134d   :  { %3316 = vpow2.f32 %v1802_v44  ;;  %v1801_v14 = vsub.f32 %v1793_v38, %v1799_v60  ;;  %v3358_v38 = vld [vmem:[%s3946_s1 + $0x8] sm:$0xff] }
0x134f   :  { %v1804_v1 = vmul.f32 1.442695, %v1801_v14 }
0x1350   :  { %v3313_v2 = vpop.eup %3312  ;;  %v1615_v42 = vpop.permute.xlu0 %1614 }
0x1351   :  { %3318 = vpow2.f32 %v1804_v1  ;;  %3154 = vmatprep.subr.mxu0 %v1615_v42  ;;  %v1605_v62 = vsel %vm259_vm2, %v3313_v2, 0.0 }
0x1352   :  { %v3315_v3 = vpop.eup %3314  ;;  %1606 = vadd.xlane.f32.xlu1 %v1605_v62  ;;  %3155 = vmatpush3.msra.mxu0 %v1615_v42 }
0x1353   :  { %3156 = vmatprep.subr.mxu0 %v1613_v63  ;;  %v1602_v61 = vsel %vm259_vm2, %v3315_v3, 0.0 }
0x1354   :  { %1603 = vadd.xlane.f32.xlu0 %v1602_v61  ;;  %3157 = vmatpush3.msra.mxu0 %v1613_v63 }
0x1355   :  { %3168 = vmatprep.subr.mxu0 %v1819_v4 }
0x135a   :  { %v3317_v5 = vpop.eup %3316 }
0x135b   :  { %v1806_v17 = vsel %vm259_vm2, %v3317_v5, 0.0 }
0x135c   :  { %1807 = vadd.xlane.f32.xlu0 %v1806_v17 }
0x135e   :  { %v3319_v6 = vpop.eup %3318 }
0x135f   :  { %v1809_v7 = vsel %vm259_vm2, %v3319_v6, 0.0 }
0x1360   :  { %1810 = vadd.xlane.f32.xlu1 %v1809_v7 }
0x1371   :  { %1907 = vrot.lane.b32.xlu1 %v3731_v23, %s3365_s24 }
0x1372   :  { %1909 = vrot.lane.b32.xlu0 %v3729_v21, %s3365_s24 }
0x1375   :  { %1905 = vrot.lane.b32.xlu1 %v3729_v21, %s3366_s25 }
0x1376   :  { %1903 = vrot.lane.b32.xlu0 %v3731_v23, %s3366_s25 }
0x13db   :  { %v1607_v10 = vpop.xlane.xlu1 %1606 }
0x13dc   :  { %3320 = vrcp.f32 %v1607_v10 }
0x13dd   :  { %v1604_v13 = vpop.xlane.xlu0 %1603 }
0x13de   :  { %3322 = vrcp.f32 %v1604_v13 }
0x13e5   :  { %v1808_v18 = vpop.xlane.xlu0 %1807 }
0x13e6   :  { %3324 = vrcp.f32 %v1808_v18 }
0x13e9   :  { %v1811_v22 = vpop.xlane.xlu1 %1810  ;;  %v3321_v24 = vpop.eup %3320 }
0x13ea   :  { %3326 = vrcp.f32 %v1811_v22  ;;  %v1611_v20 = vmul.f32 %v3321_v24, %v3313_v2  ;;  %v1910_v30 = vpop.permute.xlu0 %1909 }
0x13eb   :  { %v3323_v27 = vpop.eup %3322 }
0x13ec   :  { %v1610_v29 = vmul.f32 %v3323_v27, %v3315_v3 }
0x13ed   :  { %v1908_v19 = vpop.permute.xlu1 %1907 }
0x13ee   :  { %3158 = vmatprep.mubr.msk.f32.mxu0 %vm259_vm2, %v1610_v29  ;;  %v1904_v35 = vpop.permute.xlu0 %1903 }
0x13ef   :  { %3159 = vmatmul.mubr.msk.f32.vlgmr.msra.gmra.mxu0 %vm259_vm2, %v1611_v20 }
0x13f0   :  { %3169 = vmatpush3.msra.mxu0 %v1819_v4 }
0x13f1   :  { %3170 = vmatprep.subr.mxu0 %v1817_v8  ;;  %v1906_v37 = vpop.permute.xlu1 %1905 }
0x13f2   :  { %3171 = vmatpush3.msra.mxu0 %v1817_v8 }
0x13f3   :  { %v3325_v31 = vpop.eup %3324  ;;  %3175 = vmatprep.subr.msk.mxu0 %vm171_vm1, %v1910_v30 }
0x13f4   :  { %v1814_v32 = vmul.f32 %v3325_v31, %v3317_v5 }
0x13f6   :  { %3172 = vmatprep.mubr.msk.f32.mxu0 %vm259_vm2, %v1814_v32 }
0x13f7   :  { %v3327_v33 = vpop.eup %3326 }
0x13f8   :  { %v1815_v34 = vmul.f32 %v3327_v33, %v3319_v6 }
0x13fa   :  { %3173 = vmatmul.mubr.msk.f32.vlgmr.msra.gmra.mxu0 %vm259_vm2, %v1815_v34 }
0x13fb   :  { %3176 = vmatpush3.xpose.msk.msra.mxu0 %vm171_vm1, %v1910_v30  ;;  %3179 = vmatprep.mubr.msk.f32.mxu0 %vm171_vm1, %v1904_v35 }
0x13fc   :  { %3177 = vmatprep.subr.msk.mxu0 %vm171_vm1, %v1908_v19 }
0x13ff   :  { %3178 = vmatpush3.xpose.msk.msra.mxu0 %vm171_vm1, %v1908_v19 }
0x1402   :  { %3180 = vmatmul.mubr.msk.f32.vlgmr.msra.gmra.mxu0 %vm171_vm1, %v1906_v37 }
0x14af   :  { %v3797_v40 = vpop.f32.mrf.mxu0 }
0x14b1   :  { %v3799_v41 = vpop.f32.mrf.mxu0 }
0x14ba   :  { %v3801_v43 = vpop.f32.mrf.mxu0 }
0x14bc   :  { %v3803_v45 = vpop.f32.mrf.mxu0 }
0x14c2   :  { %v3181_v46 = vpop.f32.mrf.mxu0 }
0x14c3   :  { %v1995_v47 = vmul.f32 0.35355338, %v3181_v46 }
0x14c4   :  { %v1985_v49 = vpop.f32.mrf.mxu0 }
0x14c5   :  { %v1994_v50 = vmul.f32 0.35355338, %v1985_v49  ;;  %v1997_v36 = vadd.f32 %v3358_v38, %v1995_v47 }
0x14c7   :  { %v2001_v51 = vsel %vm259_vm2, %v1997_v36, -inf  ;;  %v1996_v54 = vadd.f32 %v3359_v53, %v1994_v50 }
0x14c8   :  { %2002 = vmax.xlane.f32.xlu1 %v2001_v51 }
0x14c9   :  { %v1998_v48 = vsel %vm259_vm2, %v1996_v54, -inf }
0x14ca   :  { %1999 = vmax.xlane.f32.xlu0 %v1998_v48 }
0x14d9   :  { %2020 = vrot.lane.b32.xlu1 %v3731_v23, %s3367_s26 }
0x14dd   :  { %2113 = vrot.lane.b32.xlu1 %v3729_v21, %s3368_s27 }
0x14e1   :  { %2111 = vrot.lane.b32.xlu1 %v3731_v23, %s3368_s27 }
0x14e5   :  { %2109 = vrot.lane.b32.xlu1 %v3729_v21, %s3369_s0 }
0x1551   :  { %v2003_v55 = vpop.xlane.xlu1 %2002 }
0x1552   :  { %v2005_v57 = vsub.f32 %v1997_v36, %v2003_v55 }
0x1553   :  { %v2000_v58 = vpop.xlane.xlu0 %1999 }
0x1554   :  { %v2008_v59 = vmul.f32 1.442695, %v2005_v57  ;;  %v2004_v44 = vsub.f32 %v1996_v54, %v2000_v58 }
0x1555   :  { %v2021_v3 = vpop.permute.xlu1 %2020 }
0x1556   :  { %3328 = vpow2.f32 %v2008_v59  ;;  %v2006_v60 = vmul.f32 1.442695, %v2004_v44 }
0x1558   :  { %3330 = vpow2.f32 %v2006_v60 }
0x1559   :  { %v2114_v4 = vpop.permute.xlu1 %2113 }
0x155d   :  { %v2112_v10 = vpop.permute.xlu1 %2111 }
0x1561   :  { %v2110_v13 = vpop.permute.xlu1 %2109 }
0x1563   :  { %v3329_v14 = vpop.eup %3328 }
0x1564   :  { %v2013_v63 = vsel %vm259_vm2, %v3329_v14, 0.0 }
0x1565   :  { %v3331_v1 = vpop.eup %3330  ;;  %2014 = vadd.xlane.f32.xlu0 %v2013_v63 }
0x1566   :  { %v2010_v2 = vsel %vm259_vm2, %v3331_v1, 0.0 }
0x1569   :  { %2011 = vadd.xlane.f32.xlu0 %v2010_v2 }
0x157f   :  { %2022 = vrot.lane.b32.xlu0 %v3729_v21, %s3367_s26 }
0x1583   :  { %2107 = vrot.lane.b32.xlu0 %v3731_v23, %s3369_s0 }
0x15ee   :  { %v2015_v42 = vpop.xlane.xlu0 %2014 }
0x15ef   :  { %3332 = vrcp.f32 %v2015_v42 }
0x15f2   :  { %v2012_v62 = vpop.xlane.xlu0 %2011 }
0x15f3   :  { %3334 = vrcp.f32 %v2012_v62 }
0x15f6   :  { %v2023_v61 = vpop.permute.xlu0 %2022 }
0x15f7   :  { %3182 = vmatprep.subr.mxu1 %v2023_v61 }
0x15f8   :  { %3183 = vmatpush3.msra.mxu1 %v2023_v61 }
0x15f9   :  { %3184 = vmatprep.subr.mxu1 %v2021_v3 }
0x15fa   :  { %3185 = vmatpush3.msra.mxu1 %v2021_v3  ;;  %v2108_v8 = vpop.permute.xlu0 %2107 }
0x15fb   :  { %3189 = vmatprep.subr.msk.mxu1 %vm171_vm1, %v2114_v4 }
0x15fc   :  { %v3333_v5 = vpop.eup %3332 }
0x15fd   :  { %v2019_v7 = vmul.f32 %v3333_v5, %v3329_v14 }
0x1600   :  { %v3335_v17 = vpop.eup %3334 }
0x1601   :  { %v2018_v6 = vmul.f32 %v3335_v17, %v3331_v1 }
0x1603   :  { %3186 = vmatprep.mubr.msk.f32.mxu1 %vm259_vm2, %v2018_v6 }
0x1604   :  { %3187 = vmatmul.mubr.msk.f32.vlgmr.msra.gmra.mxu1 %vm259_vm2, %v2019_v7 }
0x1605   :  { %3190 = vmatpush3.xpose.msk.msra.mxu1 %vm171_vm1, %v2114_v4  ;;  %3193 = vmatprep.mubr.msk.f32.mxu1 %vm171_vm1, %v2108_v8 }
0x1606   :  { %3191 = vmatprep.subr.msk.mxu1 %vm171_vm1, %v2112_v10 }
0x1609   :  { %3192 = vmatpush3.xpose.msk.msra.mxu1 %vm171_vm1, %v2112_v10 }
0x160c   :  { %3194 = vmatmul.mubr.msk.f32.vlgmr.msra.gmra.mxu1 %vm171_vm1, %v2110_v13 }
0x16c4   :  { %v3188_v18 = vpop.f32.mrf.mxu1 }
0x16c6   :  { %v2098_v22 = vpop.f32.mrf.mxu1 }
0x16cc   :  { %v3195_v24 = vpop.f32.mrf.mxu1 }
0x16cd   :  { %v2199_v27 = vmul.f32 0.35355338, %v3195_v24 }
0x16ce   :  { %v2189_v29 = vpop.f32.mrf.mxu1 }
0x16cf   :  { %v2201_v20 = vadd.f32 %v3358_v38, %v2199_v27  ;;  %v2198_v30 = vmul.f32 0.35355338, %v2189_v29 }
0x16d1   :  { %v2200_v31 = vadd.f32 %v3359_v53, %v2198_v30  ;;  %v2205_v32 = vsel %vm259_vm2, %v2201_v20, -inf }
0x16d2   :  { %2206 = vmax.xlane.f32.xlu1 %v2205_v32  ;;  %v2878_v32 = vld [vmem:[%s3943_s3 + $0x68] sm:$0xff] }
0x16d3   :  { %v2202_v33 = vsel %vm259_vm2, %v2200_v31, -inf }
0x16d4   :  { %2203 = vmax.xlane.f32.xlu0 %v2202_v33  ;;  %v2876_v33 = vld [vmem:[%s3943_s3 + $0x58] sm:$0xff] }
0x16e3   :  { %2224 = vrot.lane.b32.xlu1 %v3731_v23, %s3370_s28 }
0x16e7   :  { %2355 = vrot.lane.b32.xlu1 %v3689_v39, %s3371_s29 }
0x16eb   :  { %2353 = vrot.lane.b32.xlu1 %v3696_v15, %s3371_s29 }
0x16ef   :  { %2351 = vrot.lane.b32.xlu1 %v3703_v16, %s3371_s29 }
0x16f3   :  { %2321 = vrot.lane.b32.xlu1 %v2098_v22, %s3372_s30 }
0x175b   :  { %v2207_v34 = vpop.xlane.xlu1 %2206 }
0x175c   :  { %v2209_v35 = vsub.f32 %v2201_v20, %v2207_v34  ;;  %v2874_v34 = vld [vmem:[%s3943_s3 + $0x48] sm:$0xff] }
0x175d   :  { %v2204_v19 = vpop.xlane.xlu0 %2203 }
0x175e   :  { %v2212_v37 = vmul.f32 1.442695, %v2209_v35  ;;  %v2208_v46 = vsub.f32 %v2200_v31, %v2204_v19  ;;  %v2880_v31 = vld [vmem:[%s3943_s3 + $0x78] sm:$0xff]  ;;  %v2484_v35 = vrot.slane %v3725_v12, %v3660_v56 }
0x175f   :  { %v2225_v38 = vpop.permute.xlu1 %2224  ;;  %3214 = vmatprep.subr.mxu1 %v2880_v31 }
0x1760   :  { %3336 = vpow2.f32 %v2212_v37  ;;  %v2210_v47 = vmul.f32 1.442695, %v2208_v46  ;;  %3215 = vmatpush3.msra.mxu1 %v2880_v31 }
0x1761   :  { %3216 = vmatprep.subr.mxu1 %v2878_v32 }
0x1762   :  { %3338 = vpow2.f32 %v2210_v47  ;;  %3217 = vmatpush3.msra.mxu1 %v2878_v32 }
0x1763   :  { %3218 = vmatprep.subr.mxu1 %v2876_v33 }
0x1764   :  { %3219 = vmatpush3.msra.mxu1 %v2876_v33 }
0x1765   :  { %3220 = vmatprep.subr.mxu1 %v2874_v34 }
0x1766   :  { %3221 = vmatpush3.msra.mxu1 %v2874_v34 }
0x176d   :  { %v3337_v23 = vpop.eup %3336 }
0x176e   :  { %v2217_v49 = vsel %vm259_vm2, %v3337_v23, 0.0 }
0x176f   :  { %v3339_v39 = vpop.eup %3338  ;;  %2218 = vadd.xlane.f32.xlu0 %v2217_v49 }
0x1770   :  { %v2214_v15 = vsel %vm259_vm2, %v3339_v39, 0.0 }
0x1773   :  { %2215 = vadd.xlane.f32.xlu0 %v2214_v15 }
0x1789   :  { %2226 = vrot.lane.b32.xlu0 %v3729_v21, %s3370_s28  ;;  %v2356_v21 = vpop.permute.xlu1 %2355 }
0x178d   :  { %2313 = vrot.lane.b32.xlu0 %v3803_v45, %s3373_s8 }
0x1791   :  { %2315 = vrot.lane.b32.xlu0 %v3801_v43, %s3373_s8  ;;  %v2354_v43 = vpop.permute.xlu1 %2353 }
0x1795   :  { %2323 = vrot.lane.b32.xlu0 %v3188_v18, %s3372_s30 }
0x1799   :  { %2349 = vrot.lane.b32.xlu0 %v3710_v0, %s3371_s29  ;;  %v2352_v0 = vpop.permute.xlu1 %2351 }
0x179d   :  { %v2322_v60 = vpop.permute.xlu1 %2321 }
0x17f8   :  { %v2219_v16 = vpop.xlane.xlu0 %2218 }
0x17f9   :  { %3340 = vrcp.f32 %v2219_v16 }
0x17fc   :  { %v2216_v50 = vpop.xlane.xlu0 %2215 }
0x17fd   :  { %3342 = vrcp.f32 %v2216_v50 }
0x1800   :  { %v2227_v36 = vpop.permute.xlu0 %2226 }
0x1801   :  { %3196 = vmatprep.subr.mxu0 %v2227_v36 }
0x1802   :  { %3197 = vmatpush3.msra.mxu0 %v2227_v36 }
0x1803   :  { %3198 = vmatprep.subr.mxu0 %v2225_v38 }
0x1804   :  { %3199 = vmatpush3.msra.mxu0 %v2225_v38  ;;  %v2314_v48 = vpop.permute.xlu0 %2313 }
0x1805   :  { %3203 = vmatprep.subr.mxu0 %v2356_v21  ;;  %v2335_v14 = vsel %vm171_vm1, %v3799_v41, %v2314_v48  ;;  %v2344_v41 = vrot.slane %v3725_v12, %v3464_v28 }
0x1806   :  { %v3341_v45 = vpop.eup %3340  ;;  %v2337_v1 = vsel %vm259_vm2, %v2335_v14, %v2322_v60 }
0x1807   :  { %v2223_v54 = vmul.f32 %v3341_v45, %v3337_v23 }
0x1808   :  { %v2316_v55 = vpop.permute.xlu0 %2315 }
0x1809   :  { %v2336_v42 = vsel %vm171_vm1, %v3797_v40, %v2316_v55 }
0x180a   :  { %v3343_v51 = vpop.eup %3342 }
0x180b   :  { %v2222_v53 = vmul.f32 %v3343_v51, %v3339_v39 }
0x180c   :  { %v2324_v57 = vpop.permute.xlu0 %2323 }
0x180d   :  { %3200 = vmatprep.mubr.msk.f32.mxu0 %vm259_vm2, %v2222_v53  ;;  %v2338_v62 = vsel %vm259_vm2, %v2336_v42, %v2324_v57 }
0x180e   :  { %3201 = vmatmul.mubr.msk.f32.vlgmr.msra.gmra.mxu0 %vm259_vm2, %v2223_v54 }
0x180f   :  { %3204 = vmatpush3.msra.mxu0 %v2356_v21 }
0x1810   :  { %3205 = vmatprep.subr.mxu0 %v2354_v43  ;;  %v2350_v58 = vpop.permute.xlu0 %2349 }
0x1811   :  { %3206 = vmatpush3.msra.mxu0 %v2354_v43 }
0x1812   :  { %3207 = vmatprep.subr.mxu0 %v2352_v0 }
0x1813   :  { %3208 = vmatpush3.msra.mxu0 %v2352_v0 }
0x1814   :  { %3209 = vmatprep.subr.mxu0 %v2350_v58 }
0x1815   :  { %3210 = vmatpush3.msra.mxu0 %v2350_v58 }
0x18ce   :  { %v3202_v59 = vpop.f32.mrf.mxu0 }
0x18d0   :  { %v2302_v44 = vpop.f32.mrf.mxu0 }
0x18d1   :  { %2329 = vrot.lane.b32.xlu1 %v2302_v44, %s3374_s9 }
0x18d5   :  { %2331 = vrot.lane.b32.xlu1 %v3202_v59, %s3374_s9 }
0x1943   :  { %v2330_v63 = vpop.permute.xlu1 %2329 }
0x1944   :  { %v2339_v2 = vsel %vm1009_vm3, %v2337_v1, %v2330_v63 }
0x1945   :  { %3211 = vmatprep.mubr.msk.f32.mxu0 %vm29_vm0, %v2339_v2 }
0x1947   :  { %v2332_v3 = vpop.permute.xlu1 %2331 }
0x1948   :  { %v2340_v61 = vsel %vm1009_vm3, %v2338_v62, %v2332_v3 }
0x1949   :  { %3212 = vmatmul.mubr.msk.f32.vlgmr.msra.gmra.mxu0 %vm29_vm0, %v2340_v61 }
0x1a09   :  { %v3213_v4 = vpop.f32.mrf.mxu0 }
0x1a0a   :  { %v2439_v5 = vadd.f32 %v3213_v4, %v2344_v41 }
0x1a0b   :  { %v2433_v17 = vpop.f32.mrf.mxu0 }
0x1a0c   :  { %v2443_v6 = vadd.f32 %v2439_v5, %v3718_v11  ;;  %v2434_v7 = vadd.f32 %v2433_v17, %v2344_v41 }
0x1a0e   :  { %v2442_v8 = vadd.f32 %v2434_v7, %v3714_v9  ;;  %v2447_v40 = vsel %vm29_vm0, %v2443_v6, 0.0 }
0x1a0f   :  { %2448 = vadd.xlane.f32.xlu1 %v2447_v40 }
0x1a10   :  { %v2444_v10 = vsel %vm29_vm0, %v2442_v8, 0.0 }
0x1a11   :  { %2445 = vadd.xlane.f32.xlu0 %v2444_v10 }
0x1a20   :  { %2476 = vrot.lane.b32.xlu1 %v2344_v41, %s3361_s20 }
0x1a24   :  { %2594 = vrot.lane.b32.xlu1 %v2880_v31, %s3361_s20 }
0x1a28   :  { %2592 = vrot.lane.b32.xlu1 %v2878_v32, %s3361_s20 }
0x1a2c   :  { %2588 = vrot.lane.b32.xlu1 %v2874_v34, %s3361_s20 }
0x1a98   :  { %v2449_v13 = vpop.xlane.xlu1 %2448 }
0x1a99   :  { %v2451_v18 = vmul.f32 0.03125, %v2449_v13 }
0x1a9a   :  { %v2446_v22 = vpop.xlane.xlu0 %2445 }
0x1a9b   :  { %v2450_v24 = vmul.f32 0.03125, %v2446_v22  ;;  %v2453_v27 = vsub.f32 %v2443_v6, %v2451_v18 }
0x1a9c   :  { %v2477_v50 = vpop.permute.xlu1 %2476 }
0x1a9d   :  { %v2452_v29 = vsub.f32 %v2442_v8, %v2450_v24  ;;  %v2455_v30 = vmul.f32 %v2453_v27, %v2453_v27 }
0x1a9f   :  { %v2454_v20 = vmul.f32 %v2452_v29, %v2452_v29  ;;  %v2459_v9 = vsel %vm29_vm0, %v2455_v30, 0.0  ;;  %v2720_v30 = vrot.slane %v3725_v12, %v1391_v52  ;;  %v2731_v52 = vld [vmem:[%s3947_s5 + $0x10] sm:$0xff]  ;;  %v2730_v12 = vld [vmem:[%s3947_s5 + $0x8] sm:$0xff] }
0x1aa0   :  { %v2595_v53 = vpop.permute.xlu1 %2594 }
0x1aa1   :  { %v2456_v11 = vsel %vm29_vm0, %v2454_v20, 0.0  ;;  %3225 = vmatprep.subr.msk.mxu0 %vm1271_vm4, %v2595_v53 }
0x1aa2   :  { %2457 = vadd.xlane.f32.xlu0 %v2456_v11  ;;  %3226 = vmatpush3.xpose.msk.msra.mxu0 %vm1271_vm4, %v2595_v53 }
0x1aa4   :  { %v2593_v54 = vpop.permute.xlu1 %2592 }
0x1aa5   :  { %3227 = vmatprep.subr.msk.mxu0 %vm1271_vm4, %v2593_v54 }
0x1aa6   :  { %2460 = vadd.xlane.f32.xlu0 %v2459_v9  ;;  %3228 = vmatpush3.xpose.msk.msra.mxu0 %vm1271_vm4, %v2593_v54 }
0x1aa8   :  { %v2589_v48 = vpop.permute.xlu1 %2588 }
0x1abc   :  { %2471 = vrot.lane.b32.xlu0 %v2344_v41, %s3360_s15 }
0x1ac0   :  { %2590 = vrot.lane.b32.xlu0 %v2876_v33, %s3361_s20 }
0x1ac4   :  { %2597 = vrot.lane.b32.xlu0 %v2484_v35, %s3361_s20 }
0x1b2b   :  { %v2458_v19 = vpop.xlane.xlu0 %2457 }
0x1b2c   :  { %v2462_v37 = vmul.f32 0.03125, %v2458_v19 }
0x1b2e   :  { %v2464_v46 = vadd.f32 1e-12, %v2462_v37 }
0x1b2f   :  { %v2461_v47 = vpop.xlane.xlu0 %2460 }
0x1b30   :  { %3344 = vrsqrt.f32 %v2464_v46  ;;  %v2463_v23 = vmul.f32 0.03125, %v2461_v47 }
0x1b32   :  { %v2465_v49 = vadd.f32 1e-12, %v2463_v23  ;;  %v3375_v23 = vmov 0.0  }
0x1b33   :  { %v2472_v15 = vpop.permute.xlu0 %2471  ;;  %3236 = vmatprep.subr.mxu1 %v3375_v23 }
0x1b34   :  { %3346 = vrsqrt.f32 %v2465_v49  ;;  %v2729_v49 = vld [vmem:[%s3947_s5] sm:$0xff] }
0x1b37   :  { %v2591_v0 = vpop.permute.xlu0 %2590 }
0x1b38   :  { %3229 = vmatprep.subr.msk.mxu0 %vm1271_vm4, %v2591_v0 }
0x1b39   :  { %3230 = vmatpush3.xpose.msk.msra.mxu0 %vm1271_vm4, %v2591_v0 }
0x1b3a   :  { %3231 = vmatprep.subr.msk.mxu0 %vm1271_vm4, %v2589_v48 }
0x1b3b   :  { %v2598_v10 = vpop.permute.xlu0 %2597 }
0x1b3d   :  { %v3345_v39 = vpop.eup %3344  ;;  %3232 = vmatpush3.xpose.msk.msra.mxu0 %vm1271_vm4, %v2589_v48 }
0x1b3e   :  { %v2468_v16 = vmul.f32 %v3345_v39, %v2452_v29 }
0x1b40   :  { %v2474_v38 = vmul.f32 %v2472_v15, %v2468_v16 }
0x1b41   :  { %v3347_v36 = vpop.eup %3346 }
0x1b42   :  { %v2469_v21 = vmul.f32 %v3347_v36, %v2453_v27  ;;  %v2479_v45 = vadd.f32 %v2477_v50, %v2474_v38 }
0x1b44   :  { %v2475_v51 = vmul.f32 %v2472_v15, %v2469_v21  ;;  %3222 = vmatprep.mubr.msk.f32.mxu1 %vm29_vm0, %v2479_v45 }
0x1b46   :  { %v2480_v43 = vadd.f32 %v2477_v50, %v2475_v51 }
0x1b48   :  { %3223 = vmatmul.mubr.msk.f32.vlgmr.msra.gmra.mxu1 %vm29_vm0, %v2480_v43 }
0x1b49   :  { %3237 = vmatpush3.msra.mxu1 %v2732_v25  ;;  %3244 = vmatprep.mubr.msk.f32.mxu1 %vm3376_vm5, %v3375_v23 }
0x1b4a   :  { %3238 = vmatprep.subr.mxu1 %v3375_v23 }
0x1b4b   :  { %3239 = vmatpush3.msra.mxu1 %v2731_v52 }
0x1b4c   :  { %3240 = vmatprep.subr.mxu1 %v3375_v23 }
0x1b4d   :  { %3241 = vmatpush3.msra.mxu1 %v2730_v12 }
0x1b4e   :  { %3242 = vmatprep.subr.mxu1 %v3375_v23 }
0x1b4f   :  { %3243 = vmatpush3.msra.mxu1 %v2729_v49 }
0x1c08   :  { %v3224_v55 = vpop.f32.mrf.mxu1 }
0x1c09   :  { %v2563_v57 = vadd.f32 %v3224_v55, %v2484_v35 }
0x1c0a   :  { %v2557_v58 = vpop.f32.mrf.mxu1 }
0x1c0b   :  { %v2569_v59 = vmul.f32 0.044715, %v2563_v57  ;;  %v2558_v44 = vadd.f32 %v2557_v58, %v2484_v35  ;;  %v2567_v7 = vmul.f32 0.5, %v2563_v57 }
0x1c0d   :  { %v2571_v60 = vmul.f32 %v2569_v59, %v2563_v57  ;;  %v2568_v14 = vmul.f32 0.044715, %v2558_v44  ;;  %v2566_v17 = vmul.f32 0.5, %v2558_v44  ;;  %v2733_v59 = vld [vmem:[%s3948_s6] sm:$0x7] }
0x1c0f   :  { %v2573_v63 = vmul.f32 %v2571_v60, %v2563_v57  ;;  %v2570_v1 = vmul.f32 %v2568_v14, %v2558_v44 }
0x1c11   :  { %v2575_v2 = vadd.f32 %v2573_v63, %v2563_v57  ;;  %v2572_v42 = vmul.f32 %v2570_v1, %v2558_v44  ;;  %v2820_v1 = vrot.slane %v2733_v59, %v3464_v28 }
0x1c13   :  { %v2577_v62 = vmul.f32 0.7978846, %v2575_v2  ;;  %v2574_v3 = vadd.f32 %v2572_v42, %v2558_v44  ;;  %v2742_v44 = vrot.slane %v2733_v59, %v3458_v26 }
0x1c15   :  { %3348 = vtanh.f32 %v2577_v62  ;;  %v2576_v61 = vmul.f32 0.7978846, %v2574_v3  ;;  %v2829_v3 = vrot.slane %v2733_v59, %v3660_v56 }
0x1c17   :  { %3350 = vtanh.f32 %v2576_v61 }
0x1c22   :  { %v3349_v41 = vpop.eup %3348 }
0x1c23   :  { %v2581_v5 = vadd.f32 1.0, %v3349_v41 }
0x1c24   :  { %v3351_v4 = vpop.eup %3350 }
0x1c25   :  { %v2580_v6 = vadd.f32 1.0, %v3351_v4  ;;  %v2583_v40 = vmul.f32 %v2581_v5, %v2567_v7 }
0x1c27   :  { %v2582_v8 = vmul.f32 %v2580_v6, %v2566_v17 }
0x1c29   :  { %3233 = vmatprep.mubr.msk.f32.mxu0 %vm1271_vm4, %v2582_v8 }
0x1c2a   :  { %3234 = vmatmul.mubr.msk.f32.vlgmr.msra.gmra.mxu0 %vm1271_vm4, %v2583_v40 }
0x1cea   :  { %v3235_v13 = vpop.f32.mrf.mxu0 }
0x1ceb   :  { %v2686_v18 = vadd.f32 %v3235_v13, %v2598_v10 }
0x1cec   :  { %v2680_v22 = vpop.f32.mrf.mxu0 }
0x1ced   :  { %v2681_v24 = vadd.f32 %v2680_v22, %v2598_v10  ;;  %v2690_v27 = vadd.f32 %v2686_v18, %v2480_v43 }
0x1cef   :  { %v2689_v29 = vadd.f32 %v2681_v24, %v2479_v45  ;;  %v2694_v20 = vsel %vm29_vm0, %v2690_v27, 0.0 }
0x1cf0   :  { %2695 = vadd.xlane.f32.xlu1 %v2694_v20 }
0x1cf1   :  { %v2691_v11 = vsel %vm29_vm0, %v2689_v29, 0.0 }
0x1cf2   :  { %2692 = vadd.xlane.f32.xlu0 %v2691_v11 }
0x1d01   :  { %2724 = vrot.lane.b32.xlu1 %v2720_v30, %s3360_s15 }
0x1d79   :  { %v2696_v9 = vpop.xlane.xlu1 %2695 }
0x1d7a   :  { %v2698_v31 = vmul.f32 0.03125, %v2696_v9 }
0x1d7b   :  { %v2693_v32 = vpop.xlane.xlu0 %2692 }
0x1d7c   :  { %v2700_v33 = vsub.f32 %v2690_v27, %v2698_v31  ;;  %v2697_v34 = vmul.f32 0.03125, %v2693_v32 }
0x1d7d   :  { %v2725_v51 = vpop.permute.xlu1 %2724 }
0x1d7e   :  { %v2699_v35 = vsub.f32 %v2689_v29, %v2697_v34  ;;  %v2702_v19 = vmul.f32 %v2700_v33, %v2700_v33 }
0x1d80   :  { %v2706_v37 = vsel %vm29_vm0, %v2702_v19, 0.0  ;;  %v2701_v46 = vmul.f32 %v2699_v35, %v2699_v35 }
0x1d81   :  { %2707 = vadd.xlane.f32.xlu0 %v2706_v37 }
0x1d82   :  { %v2703_v47 = vsel %vm29_vm0, %v2701_v46, 0.0 }
0x1d85   :  { %2704 = vadd.xlane.f32.xlu0 %v2703_v47 }
0x1e0a   :  { %v2708_v39 = vpop.xlane.xlu0 %2707 }
0x1e0b   :  { %v2710_v15 = vmul.f32 0.03125, %v2708_v39 }
0x1e0d   :  { %v2712_v16 = vadd.f32 1e-12, %v2710_v15 }
0x1e0e   :  { %v2705_v50 = vpop.xlane.xlu0 %2704 }
0x1e0f   :  { %3352 = vrsqrt.f32 %v2712_v16  ;;  %v2709_v38 = vmul.f32 0.03125, %v2705_v50 }
0x1e11   :  { %v2711_v36 = vadd.f32 1e-12, %v2709_v38 }
0x1e13   :  { %3354 = vrsqrt.f32 %v2711_v36 }
0x1e1c   :  { %v3353_v21 = vpop.eup %3352 }
0x1e1d   :  { %v2716_v45 = vmul.f32 %v3353_v21, %v2700_v33 }
0x1e1f   :  { %v2722_v43 = vmul.f32 %v2720_v30, %v2716_v45 }
0x1e20   :  { %v3355_v53 = vpop.eup %3354 }
0x1e21   :  { %v2715_v54 = vmul.f32 %v3355_v53, %v2699_v35  ;;  %v2728_v0 = vadd.f32 %v2725_v51, %v2722_v43 }
0x1e23   :  { %v2721_v48 = vmul.f32 %v2720_v30, %v2715_v54  ;;  %v2735_v57 = vrot.slane %v2728_v0, 7 }
0x1e25   :  { %v2727_v55 = vadd.f32 %v2725_v51, %v2721_v48 }
0x1e27   :  { %v2738_v58 = vsel %vm2737_vm6, %v2727_v55, %v2735_v57 }
0x1e28   :  { %3245 = vmatmul.mubr.msk.f32.vlgmr.msra.gmra.mxu1 %vm29_vm0, %v2738_v58 }
0x1ee8   :  { %v2812_v60 = vpop.f32.mrf.mxu1 }
0x1ee9   :  { %v2813_v14 = vadd.f32 %v2812_v60, %v2742_v44 }
0x1eea   :  { %v3246_v63 = vpop.f32.mrf.mxu1 }
0x1eeb   :  { %3356 = vtanh.f32 %v2813_v14 }
0x1ef8   :  { %v3357_v2 = vpop.eup %3356 }
0x1ef9   :  { %v2821_v42 = vmul.f32 %v3357_v2, %v2820_v1 }
0x1efb   :  { %v2823_v62 = vsel %vm2822_vm7, %v2821_v42, 0.0 }
0x1efc   :  { %2824 = vadd.xlane.f32.xlu0 %v2823_v62 }
0x1f85   :  { %v2825_v61 = vpop.xlane.xlu0 %2824 }
0x1f86   :  { %v2830_v41 = vadd.f32 %v2829_v3, %v2825_v61 }
0x1f88   :  { %2832 = vst.msk [vmem:[%s3949_s7] sm:$0x3] %vm2831_vm8, %v2830_v41 }

</bundles_post_ra>
